<compile_context>
chip_gen: v7x
topology: tpu7x:2x2x1
jax: 0.10.0
libtpu: 0.0.40
codegen_flags: <defaults>
</compile_context>

<pallas_src>
import functools

import jax
import jax.numpy as jnp
from jax.experimental import pallas as pl
from jax.experimental.pallas import tpu as pltpu

NUM_CLASSES = 8
OVERLAP_THRESH = 0.5
NEG_POS_RATIO = 3          # the reference hard-codes 3 inside hard_negative_mining
VARIANCE = (0.1, 0.2)
BISECT_ITERS = 30          # resolves the f32 threshold on [0, max(CE)] to sub-ulp


def _vmem_limit_bytes():
    # Generation-aware scoped-VMEM cap (64 MiB physical on v7x, 128 MiB on v5e/v6e).
    # Both kernels need only a few MiB; half-physical capped at 32 MiB is safe everywhere.
    try:
        cap = int(pltpu.get_tpu_info().vmem_capacity_bytes)
    except Exception:   # interpret mode / older API -> conservative fallback
        cap = 64 * 1024 * 1024
    return min(cap // 2, 32 * 1024 * 1024)


VMEM_LIMIT = _vmem_limit_bytes()


def _identity(n, dtype):
    # identity built from iotas (avoids closing over array constants inside the kernel)
    r = jax.lax.broadcasted_iota(jnp.int32, (n, n), 0)
    c = jax.lax.broadcasted_iota(jnp.int32, (n, n), 1)
    return (r == c).astype(dtype)


# ----------------------------------------------------------------------------
# Kernel 1: SSD match + encode (one batch image per grid step, P on lanes)
# ----------------------------------------------------------------------------
def _match_kernel(num_objs_ref, gt_ref, priors_ref,
                  loc_t_ref, conf_t_ref, npos_ref,
                  *, threshold, var0, var1):
    b = pl.program_id(0)
    n_obj = num_objs_ref[b]                    # int32 scalar (SMEM, scalar prefetch)

    gt = gt_ref[0]                             # (G, 5)  [xmin, ymin, xmax, ymax, label]
    pri = priors_ref[...]                      # (4, P)  [cx, cy, w, h] rows, P on lanes
    G = gt.shape[0]
    P = pri.shape[1]

    # priors in point form, kept as (1, P) lane-dense rows
    pcx, pcy = pri[0:1, :], pri[1:2, :]
    pw, ph = pri[2:3, :], pri[3:4, :]
    p_xmin = pcx - 0.5 * pw
    p_ymin = pcy - 0.5 * ph
    p_xmax = pcx + 0.5 * pw
    p_ymax = pcy + 0.5 * ph

    # gt coords as (G, 1) columns (tiny, broadcast over sublanes)
    t_xmin = gt[:, 0:1]
    t_ymin = gt[:, 1:2]
    t_xmax = gt[:, 2:3]
    t_ymax = gt[:, 3:4]
    t_label = gt[:, 4:5].astype(jnp.int32)     # integer label path

    # jaccard overlap matrix (G, P): gts on sublanes, priors on lanes
    iw = jnp.maximum(jnp.minimum(p_xmax, t_xmax) - jnp.maximum(p_xmin, t_xmin), 0.0)
    ih = jnp.maximum(jnp.minimum(p_ymax, t_ymax) - jnp.maximum(p_ymin, t_ymin), 0.0)
    inter = iw * ih                                  # (G, P)
    area_p = (p_xmax - p_xmin) * (p_ymax - p_ymin)   # (1, P), > 0 for real priors
    area_t = (t_xmax - t_xmin) * (t_ymax - t_ymin)   # (G, 1)
    # divide -> EUP approx reciprocal (IoU only feeds argmax / 0.5-threshold compares)
    overlaps = inter * pl.reciprocal(area_p + area_t - inter, approx=True)

    gt_idx = jax.lax.broadcasted_iota(jnp.int32, (G, P), 0)
    prior_idx = jax.lax.broadcasted_iota(jnp.int32, (G, P), 1)

    # mask padded GT rows: they can neither win the per-prior argmax nor force a prior
    valid = gt_idx < n_obj                                                          # (G, P)
    overlaps = jnp.where(valid, overlaps, -1.0)

    # best prior per gt (argmax over the lane/prior axis)
    best_prior_ov = jnp.max(overlaps, axis=1, keepdims=True)                        # (G, 1)
    best_prior_idx = jnp.min(
        jnp.where(overlaps == best_prior_ov, prior_idx, P), axis=1, keepdims=True)  # (G, 1)

    # best gt per prior (argmax over the gt sublane axis; invalid rows are -1 so a
    # valid gt always wins when one exists)
    best_truth_ov = jnp.max(overlaps, axis=0, keepdims=True)                        # (1, P)
    best_truth_idx = jnp.min(
        jnp.where(overlaps == best_truth_ov, gt_idx, G), axis=0, keepdims=True)     # (1, P)

    # force every VALID gt's best prior to be matched to that gt (scatter-free version
    # of the reference's index_fill + loop; last gt wins ties, like the reference loop).
    hit = jnp.logical_and(best_prior_idx == prior_idx, valid)                       # (G, P)
    forced_gt = jnp.max(jnp.where(hit, gt_idx, -1), axis=0, keepdims=True)          # (1, P)
    forced = forced_gt >= 0
    best_truth_ov = jnp.where(forced, 2.0, best_truth_ov)
    best_truth_idx = jnp.where(forced, forced_gt, best_truth_idx)

    # gather the matched gt row with a VPU select-accumulate over the G sublanes
    # (kept as VPU work on purpose: an MXU formulation would run at <4% utilization).
    onehot = best_truth_idx == gt_idx                                               # (G, P)
    m_xmin = jnp.sum(jnp.where(onehot, t_xmin, 0.0), axis=0, keepdims=True)         # (1, P)
    m_ymin = jnp.sum(jnp.where(onehot, t_ymin, 0.0), axis=0, keepdims=True)
    m_xmax = jnp.sum(jnp.where(onehot, t_xmax, 0.0), axis=0, keepdims=True)
    m_ymax = jnp.sum(jnp.where(onehot, t_ymax, 0.0), axis=0, keepdims=True)
    m_label = jnp.sum(jnp.where(onehot, t_label, 0), axis=0, keepdims=True)         # (1, P)

    # confidence targets: background (0) where overlap below threshold
    conf = jnp.where(best_truth_ov < threshold, 0, m_label)
    conf_t_ref[0] = conf                                                            # (1, P)

    # encode matched corner-form boxes into variance-scaled offsets; divides replaced by
    # one reciprocal per prior row + multiplies, 1/variance folded into constants.
    # (width clamp keeps degenerate boxes finite; such priors end up background anyway)
    inv_pw = pl.reciprocal(pw)
    inv_ph = pl.reciprocal(ph)
    inv_v0 = 1.0 / var0
    inv_v1 = 1.0 / var1
    m_w = jnp.maximum(m_xmax - m_xmin, 1e-12)
    m_h = jnp.maximum(m_ymax - m_ymin, 1e-12)
    g_cx = ((m_xmin + m_xmax) * 0.5 - pcx) * inv_pw * inv_v0
    g_cy = ((m_ymin + m_ymax) * 0.5 - pcy) * inv_ph * inv_v0
    g_w = jnp.log(m_w * inv_pw) * inv_v1
    g_h = jnp.log(m_h * inv_ph) * inv_v1
    loc_t_ref[0] = jnp.concatenate([g_cx, g_cy, g_w, g_h], axis=0)                  # (4, P)

    # per-image positive count as a lane-dense (1, 128) slab (avoids a separate XLA
    # reduction over conf_t in the wrapper)
    npos_ref[0] = jnp.broadcast_to(
        jnp.sum((conf > 0).astype(jnp.float32), keepdims=True), (1, 128))


def match_targets(gt, priors, num_objs, *, threshold=OVERLAP_THRESH, variance=VARIANCE):
    B, G, _ = gt.shape
    P = priors.shape[0]
    priors_t = jnp.transpose(priors, (1, 0))   # tiny (P,4)->(4,P), once per call

    kernel = functools.partial(
        _match_kernel, threshold=float(threshold),
        var0=float(variance[0]), var1=float(variance[1]))

    loc_t, conf_t, npos = pl.pallas_call(
        kernel,
        grid_spec=pltpu.PrefetchScalarGridSpec(
            num_scalar_prefetch=1,
            grid=(B,),
            in_specs=[
                pl.BlockSpec((1, G, 5), lambda b, nobj: (b, 0, 0)),
                pl.BlockSpec((4, P), lambda b, nobj: (0, 0)),
            ],
            out_specs=[
                pl.BlockSpec((1, 4, P), lambda b, nobj: (b, 0, 0)),
                pl.BlockSpec((1, 1, P), lambda b, nobj: (b, 0, 0)),
                pl.BlockSpec((1, 1, 128), lambda b, nobj: (b, 0, 0)),
            ],
        ),
        out_shape=[
            jax.ShapeDtypeStruct((B, 4, P), jnp.float32),
            jax.ShapeDtypeStruct((B, 1, P), jnp.int32),
            jax.ShapeDtypeStruct((B, 1, 128), jnp.float32),
        ],
        compiler_params=pltpu.CompilerParams(
            dimension_semantics=("parallel",),
            vmem_limit_bytes=VMEM_LIMIT),
    )(num_objs.astype(jnp.int32), gt, priors_t)
    return loc_t, conf_t, npos        # (B,4,P), (B,1,P), (B,1,128)


# ----------------------------------------------------------------------------
# Kernel 2: SmoothL1 + cross-entropy + hard negative mining (one image per step)
# ----------------------------------------------------------------------------
def _loss_kernel(n_total_ref, loc_p_ref, score_p_ref, loc_t_ref, conf_t_ref,
                 loc_out_ref, conf_out_ref, *, neg_pos_ratio):
    n_total = n_total_ref[0].astype(jnp.float32)     # batch-wide positive count (SMEM)

    conf = conf_t_ref[0]                             # (1, P) int32
    pos = conf > 0
    pos_f = pos.astype(jnp.float32)                  # (1, P)
    num_pos = jnp.sum(pos_f, keepdims=True)          # (1, 1) per-image

    # In-kernel relayout of the network predictions to lane-dense (coord/class on
    # sublanes, P on lanes) using tiny identity matmuls on the otherwise idle MXU
    # (contract-last-with-last, i.e. the eye @ X.T pattern).  Replaces two wrapper-side
    # XLA transposes that each cost a full HBM read+write pass over the activations.
    lp_pc = loc_p_ref[0]                             # (P, 4)
    x_pc = score_p_ref[0]                            # (P, C)
    P = lp_pc.shape[0]
    C = x_pc.shape[1]
    dn = (((1,), (1,)), ((), ()))                    # contract lhs dim1 with rhs dim1
    lp = jax.lax.dot_general(_identity(4, jnp.float32), lp_pc, dn,
                             preferred_element_type=jnp.float32)      # (4, P)
    x = jax.lax.dot_general(_identity(C, jnp.float32), x_pc, dn,
                            preferred_element_type=jnp.float32)       # (C, P)

    # localization loss: SmoothL1 (reduction='sum') over positive priors
    d = lp - loc_t_ref[0]                            # (4, P)
    ad = jnp.abs(d)
    sl1 = jnp.where(ad < 1.0, 0.5 * d * d, ad - 0.5)
    loc_loss = jnp.sum(sl1 * pos_f, keepdims=True)   # (1, 1)

    # per-box cross entropy (== reference log_sum_exp - x.gather(y), computed stably);
    # class axis on sublanes (C=8 -> cheap sublane reduce), P on lanes
    m = jnp.max(x, axis=0, keepdims=True)
    lse = jnp.log(jnp.sum(jnp.exp(x - m), axis=0, keepdims=True)) + m
    cls_iota = jax.lax.broadcasted_iota(jnp.int32, (C, P), 0)
    x_y = jnp.sum(jnp.where(cls_iota == conf, x, 0.0), axis=0, keepdims=True)
    ce = lse - x_y                                   # (1, P)

    # hard negative mining via threshold bisection on the pos-zeroed loss row:
    # O(P * BISECT_ITERS) VALU/XLU work, no (P, P) intermediates (the old counting rank
    # needed ~300 MB at P~8732 and dominated wall time).  The reference clamp uses the
    # batch-wide positive count (num_boxes - sum(num_pos) - 1), the 3x factor per image.
    cl = jnp.where(pos, 0.0, ce)                     # (1, P) mining loss, 0 at positives
    num_neg = jnp.minimum(neg_pos_ratio * num_pos,
                          jnp.float32(P) - n_total - 1.0)              # (1, 1)

    lo0 = jnp.zeros((1, 1), jnp.float32)
    hi0 = jnp.max(cl, keepdims=True)                 # (1, 1)

    def _bisect(_, carry):
        lo, hi = carry
        mid = 0.5 * (lo + hi)
        cnt = jnp.sum((cl > mid).astype(jnp.float32), keepdims=True)
        too_many = cnt > num_neg
        return jnp.where(too_many, mid, lo), jnp.where(too_many, hi, mid)

    _, thr = jax.lax.fori_loop(0, BISECT_ITERS, _bisect, (lo0, hi0))
    neg = cl > thr                                   # top-num_neg hardest negatives
    # ties exactly at the threshold are dropped; torch.sort's tie order is unspecified
    # and any dropped tie is either a positive (already selected) or a zero-loss box.

    sel = jnp.logical_or(pos, neg).astype(jnp.float32)
    conf_loss = jnp.sum(ce * sel, keepdims=True)     # (1, 1)

    # lane-dense (1, 128) scalar slabs (avoid masked narrow stores)
    loc_out_ref[0] = jnp.broadcast_to(loc_loss, (1, 128))
    conf_out_ref[0] = jnp.broadcast_to(conf_loss, (1, 128))


def multibox_loss_sums(loc_preds, score_preds, loc_t, conf_t, n_total_i,
                       *, neg_pos_ratio=NEG_POS_RATIO):
    """loc_preds (B,P,4), score_preds (B,P,C) in their native layout; loc_t (B,4,P),
    conf_t (B,1,P) lane-dense from the match kernel; n_total_i: scalar int32 batch-wide
    positive count (scalar prefetch)."""
    B, P, C = score_preds.shape
    kernel = functools.partial(_loss_kernel, neg_pos_ratio=float(neg_pos_ratio))
    n_total_arr = jnp.reshape(n_total_i.astype(jnp.int32), (1,))

    loc_b, conf_b = pl.pallas_call(
        kernel,
        grid_spec=pltpu.PrefetchScalarGridSpec(
            num_scalar_prefetch=1,
            grid=(B,),
            in_specs=[
                pl.BlockSpec((1, P, 4), lambda b, nt: (b, 0, 0)),
                pl.BlockSpec((1, P, C), lambda b, nt: (b, 0, 0)),
                pl.BlockSpec((1, 4, P), lambda b, nt: (b, 0, 0)),
                pl.BlockSpec((1, 1, P), lambda b, nt: (b, 0, 0)),
            ],
            out_specs=[
                pl.BlockSpec((1, 1, 128), lambda b, nt: (b, 0, 0)),
                pl.BlockSpec((1, 1, 128), lambda b, nt: (b, 0, 0)),
            ],
        ),
        out_shape=[
            jax.ShapeDtypeStruct((B, 1, 128), jnp.float32),
            jax.ShapeDtypeStruct((B, 1, 128), jnp.float32),
        ],
        compiler_params=pltpu.CompilerParams(
            dimension_semantics=("parallel",),
            vmem_limit_bytes=VMEM_LIMIT),
    )(n_total_arr, loc_preds, score_preds, loc_t, conf_t)

    return jnp.sum(loc_b[:, 0, 0]), jnp.sum(conf_b[:, 0, 0])


def multibox_loss_forward(loc_preds, score_preds, gt, priors, num_objs=None):
    """Full MultiBoxLoss.forward: returns (loc_loss, conf_loss), each divided by N.
    Fully on-device / jittable (no host sync).  (The reference returns a single zeros(1)
    when no box matches; here both losses are 0 in that case.)"""
    if num_objs is None:
        num_objs = jnp.full((gt.shape[0],), gt.shape[1], dtype=jnp.int32)

    loc_t, conf_t, npos = match_targets(gt, priors, num_objs)   # (B,4,P),(B,1,P),(B,1,128)
    n_total_f = jnp.sum(npos[:, 0, 0])                          # tiny (B,) reduce
    n_total_i = n_total_f.astype(jnp.int32)

    loc_sum, conf_sum = multibox_loss_sums(loc_preds, score_preds, loc_t, conf_t, n_total_i)

    denom = jnp.maximum(n_total_f, 1.0)
    loc_loss = jnp.where(n_total_f > 0.0, loc_sum / denom, 0.0)
    conf_loss = jnp.where(n_total_f > 0.0, conf_sum / denom, 0.0)
    return loc_loss, conf_loss


# ----------------------------------------------------------------------------
# Demo
# ----------------------------------------------------------------------------
if __name__ == "__main__":
    B, P, G, C = 2, 128, 8, NUM_CLASSES
    key = jax.random.PRNGKey(0)
    k1, k2, k3, k4, k5, k6, k7 = jax.random.split(key, 7)

    # priors: 16x8 grid of center-form default boxes
    cx = (jnp.arange(P, dtype=jnp.float32) % 16 + 0.5) / 16.0
    cy = (jnp.arange(P, dtype=jnp.float32) // 16 + 0.5) / 8.0
    w = 0.12 + 0.08 * jax.random.uniform(k1, (P,), jnp.float32)
    h = 0.12 + 0.08 * jax.random.uniform(k2, (P,), jnp.float32)
    priors = jnp.stack([cx, cy, w, h], axis=1)

    # ground truth: corner-form boxes with labels in [1, C-1], padded to G rows
    centers = jax.random.uniform(k3, (B, G, 2), jnp.float32, minval=0.2, maxval=0.8)
    sizes = jax.random.uniform(k4, (B, G, 2), jnp.float32, minval=0.1, maxval=0.3)
    gt_boxes = jnp.concatenate([centers - sizes / 2.0, centers + sizes / 2.0], axis=-1)
    gt_labels = jax.random.randint(k5, (B, G), 1, C).astype(jnp.float32)
    gt = jnp.concatenate([gt_boxes, gt_labels[..., None]], axis=-1)   # (B, G, 5)

    # variable number of real objects per image (rows >= num_objs are padding)
    num_objs = jnp.array([G, G - 3], dtype=jnp.int32)

    # deterministic "network" predictions (synthetic; no checkpoint load)
    loc_preds = 0.1 * jax.random.normal(k6, (B, P, 4), jnp.float32)
    score_preds = jax.random.normal(k7, (B, P, C), jnp.float32)

    fwd = jax.jit(multibox_loss_forward)
    loc_loss, conf_loss = fwd(loc_preds, score_preds, gt, priors, num_objs)
    jax.block_until_ready((loc_loss, conf_loss))
    assert bool(jnp.isfinite(loc_loss)) and bool(jnp.isfinite(conf_loss))
    print("KERNEL_OK")
</pallas_src>

<mosaic_0001>
module attributes {stable_mosaic.version = 11 : i64} {
  func.func @_match_kernel(%arg0: i32, %arg1: memref<2xi32, #tpu.memory_space<smem>>, %arg2: memref<1x8x5xf32, #tpu.memory_space<vmem>>, %arg3: memref<4x128xf32, #tpu.memory_space<vmem>>, %arg4: memref<1x4x128xf32, #tpu.memory_space<vmem>>, %arg5: memref<1x1x128xi32, #tpu.memory_space<vmem>>, %arg6: memref<1x1x128xf32, #tpu.memory_space<vmem>>) attributes {dimension_semantics = [#tpu.dimension_semantics<parallel>], iteration_bounds = array<i64: 2>, scalar_prefetch = 1 : i64, scratch_operands = 0 : i64, tpu.core_type = #tpu.core_type<tc>, window_params = [{transform_indices = @transform_0, window_bounds = array<i64: 1, 8, 5>}, {pipeline_mode = #tpu.pipeline_mode<synchronous>, transform_indices = @transform_1, window_bounds = array<i64: 4, 128>}, {transform_indices = @transform_2, window_bounds = array<i64: 1, 4, 128>}, {transform_indices = @transform_3, window_bounds = array<i64: 1, 1, 128>}, {transform_indices = @transform_4, window_bounds = array<i64: 1, 1, 128>}]} {
    %0 = arith.index_cast %arg0 : i32 to index
    %1 = memref.load %arg1[%0] : memref<2xi32, #tpu.memory_space<smem>>
    %c0 = arith.constant 0 : index
    %c0_0 = arith.constant 0 : index
    %c0_1 = arith.constant 0 : index
    %2 = vector.load %arg2[%c0, %c0_0, %c0_1] : memref<1x8x5xf32, #tpu.memory_space<vmem>>, vector<1x8x5xf32>
    %3 = vector.shape_cast %2 : vector<1x8x5xf32> to vector<8x5xf32>
    %c0_2 = arith.constant 0 : index
    %c0_3 = arith.constant 0 : index
    %4 = vector.load %arg3[%c0_2, %c0_3] : memref<4x128xf32, #tpu.memory_space<vmem>>, vector<4x128xf32>
    %5 = vector.extract_strided_slice %4 {offsets = [0, 0], sizes = [1, 128], strides = [1, 1]} : vector<4x128xf32> to vector<1x128xf32>
    %6 = vector.extract_strided_slice %4 {offsets = [1, 0], sizes = [1, 128], strides = [1, 1]} : vector<4x128xf32> to vector<1x128xf32>
    %7 = vector.extract_strided_slice %4 {offsets = [2, 0], sizes = [1, 128], strides = [1, 1]} : vector<4x128xf32> to vector<1x128xf32>
    %8 = vector.extract_strided_slice %4 {offsets = [3, 0], sizes = [1, 128], strides = [1, 1]} : vector<4x128xf32> to vector<1x128xf32>
    %cst = arith.constant 5.000000e-01 : f32
    %9 = vector.broadcast %cst : f32 to vector<1x128xf32>
    %10 = arith.mulf %9, %7 : vector<1x128xf32>
    %11 = arith.subf %5, %10 : vector<1x128xf32>
    %cst_4 = arith.constant 5.000000e-01 : f32
    %12 = vector.broadcast %cst_4 : f32 to vector<1x128xf32>
    %13 = arith.mulf %12, %8 : vector<1x128xf32>
    %14 = arith.subf %6, %13 : vector<1x128xf32>
    %cst_5 = arith.constant 5.000000e-01 : f32
    %15 = vector.broadcast %cst_5 : f32 to vector<1x128xf32>
    %16 = arith.mulf %15, %7 : vector<1x128xf32>
    %17 = arith.addf %5, %16 : vector<1x128xf32>
    %cst_6 = arith.constant 5.000000e-01 : f32
    %18 = vector.broadcast %cst_6 : f32 to vector<1x128xf32>
    %19 = arith.mulf %18, %8 : vector<1x128xf32>
    %20 = arith.addf %6, %19 : vector<1x128xf32>
    %21 = vector.extract_strided_slice %3 {offsets = [0, 0], sizes = [8, 1], strides = [1, 1]} : vector<8x5xf32> to vector<8x1xf32>
    %22 = vector.extract_strided_slice %3 {offsets = [0, 1], sizes = [8, 1], strides = [1, 1]} : vector<8x5xf32> to vector<8x1xf32>
    %23 = vector.extract_strided_slice %3 {offsets = [0, 2], sizes = [8, 1], strides = [1, 1]} : vector<8x5xf32> to vector<8x1xf32>
    %24 = vector.extract_strided_slice %3 {offsets = [0, 3], sizes = [8, 1], strides = [1, 1]} : vector<8x5xf32> to vector<8x1xf32>
    %25 = vector.extract_strided_slice %3 {offsets = [0, 4], sizes = [8, 1], strides = [1, 1]} : vector<8x5xf32> to vector<8x1xf32>
    %26 = arith.fptosi %25 : vector<8x1xf32> to vector<8x1xi32>
    %27 = vector.broadcast %17 : vector<1x128xf32> to vector<8x128xf32>
    %28 = vector.broadcast %23 : vector<8x1xf32> to vector<8x128xf32>
    %29 = arith.minimumf %27, %28 : vector<8x128xf32>
    %30 = vector.broadcast %11 : vector<1x128xf32> to vector<8x128xf32>
    %31 = vector.broadcast %21 : vector<8x1xf32> to vector<8x128xf32>
    %32 = arith.maximumf %30, %31 : vector<8x128xf32>
    %33 = arith.subf %29, %32 : vector<8x128xf32>
    %cst_7 = arith.constant 0.000000e+00 : f32
    %34 = vector.broadcast %cst_7 : f32 to vector<8x128xf32>
    %35 = arith.maximumf %33, %34 : vector<8x128xf32>
    %36 = vector.broadcast %20 : vector<1x128xf32> to vector<8x128xf32>
    %37 = vector.broadcast %24 : vector<8x1xf32> to vector<8x128xf32>
    %38 = arith.minimumf %36, %37 : vector<8x128xf32>
    %39 = vector.broadcast %14 : vector<1x128xf32> to vector<8x128xf32>
    %40 = vector.broadcast %22 : vector<8x1xf32> to vector<8x128xf32>
    %41 = arith.maximumf %39, %40 : vector<8x128xf32>
    %42 = arith.subf %38, %41 : vector<8x128xf32>
    %cst_8 = arith.constant 0.000000e+00 : f32
    %43 = vector.broadcast %cst_8 : f32 to vector<8x128xf32>
    %44 = arith.maximumf %42, %43 : vector<8x128xf32>
    %45 = arith.mulf %35, %44 : vector<8x128xf32>
    %46 = arith.subf %17, %11 : vector<1x128xf32>
    %47 = arith.subf %20, %14 : vector<1x128xf32>
    %48 = arith.mulf %46, %47 : vector<1x128xf32>
    %49 = arith.subf %23, %21 : vector<8x1xf32>
    %50 = arith.subf %24, %22 : vector<8x1xf32>
    %51 = arith.mulf %49, %50 : vector<8x1xf32>
    %52 = vector.broadcast %48 : vector<1x128xf32> to vector<8x128xf32>
    %53 = vector.broadcast %51 : vector<8x1xf32> to vector<8x128xf32>
    %54 = arith.addf %52, %53 : vector<8x128xf32>
    %55 = arith.subf %54, %45 : vector<8x128xf32>
    %56 = tpu.reciprocal %55 {approx = true} : vector<8x128xf32> -> vector<8x128xf32>
    %57 = arith.mulf %45, %56 : vector<8x128xf32>
    %58 = tpu.iota {dimensions = array<i32: 0>} : vector<8x128xi32>
    %59 = tpu.iota {dimensions = array<i32: 1>} : vector<8x128xi32>
    %60 = vector.broadcast %1 : i32 to vector<8x128xi32>
    %61 = arith.cmpi slt, %58, %60 : vector<8x128xi32>
    %cst_9 = arith.constant -1.000000e+00 : f32
    %62 = vector.broadcast %cst_9 : f32 to vector<8x128xf32>
    %63 = arith.select %61, %57, %62 : vector<8x128xi1>, vector<8x128xf32>
    %cst_10 = arith.constant dense<0xFF800000> : vector<8xf32>
    %64 = vector.multi_reduction <maximumf>, %63, %cst_10 [1] : vector<8x128xf32> to vector<8xf32>
    %65 = vector.shape_cast %64 : vector<8xf32> to vector<8x1xf32>
    %66 = vector.broadcast %65 : vector<8x1xf32> to vector<8x128xf32>
    %67 = arith.cmpf oeq, %63, %66 : vector<8x128xf32>
    %c128_i32 = arith.constant 128 : i32
    %68 = vector.broadcast %c128_i32 : i32 to vector<8x128xi32>
    %69 = arith.select %67, %59, %68 : vector<8x128xi1>, vector<8x128xi32>
    %cst_11 = arith.constant dense<2147483647> : vector<8xi32>
    %70 = vector.multi_reduction <minsi>, %69, %cst_11 [1] : vector<8x128xi32> to vector<8xi32>
    %71 = vector.shape_cast %70 : vector<8xi32> to vector<8x1xi32>
    %cst_12 = arith.constant dense<0xFF800000> : vector<128xf32>
    %72 = vector.multi_reduction <maximumf>, %63, %cst_12 [0] : vector<8x128xf32> to vector<128xf32>
    %73 = vector.shape_cast %72 : vector<128xf32> to vector<1x128xf32>
    %74 = vector.broadcast %73 : vector<1x128xf32> to vector<8x128xf32>
    %75 = arith.cmpf oeq, %63, %74 : vector<8x128xf32>
    %c8_i32 = arith.constant 8 : i32
    %76 = vector.broadcast %c8_i32 : i32 to vector<8x128xi32>
    %77 = arith.select %75, %58, %76 : vector<8x128xi1>, vector<8x128xi32>
    %cst_13 = arith.constant dense<2147483647> : vector<128xi32>
    %78 = vector.multi_reduction <minsi>, %77, %cst_13 [0] : vector<8x128xi32> to vector<128xi32>
    %79 = vector.shape_cast %78 : vector<128xi32> to vector<1x128xi32>
    %80 = vector.broadcast %71 : vector<8x1xi32> to vector<8x128xi32>
    %81 = arith.cmpi eq, %80, %59 : vector<8x128xi32>
    %82 = arith.andi %81, %61 : vector<8x128xi1>
    %c-1_i32 = arith.constant -1 : i32
    %83 = vector.broadcast %c-1_i32 : i32 to vector<8x128xi32>
    %84 = arith.select %82, %58, %83 : vector<8x128xi1>, vector<8x128xi32>
    %cst_14 = arith.constant dense<-2147483648> : vector<128xi32>
    %85 = vector.multi_reduction <maxsi>, %84, %cst_14 [0] : vector<8x128xi32> to vector<128xi32>
    %86 = vector.shape_cast %85 : vector<128xi32> to vector<1x128xi32>
    %c0_i32 = arith.constant 0 : i32
    %87 = vector.broadcast %c0_i32 : i32 to vector<1x128xi32>
    %88 = arith.cmpi sge, %86, %87 : vector<1x128xi32>
    %cst_15 = arith.constant 2.000000e+00 : f32
    %89 = vector.broadcast %cst_15 : f32 to vector<1x128xf32>
    %90 = arith.select %88, %89, %73 : vector<1x128xi1>, vector<1x128xf32>
    %91 = arith.select %88, %86, %79 : vector<1x128xi1>, vector<1x128xi32>
    %92 = vector.broadcast %91 : vector<1x128xi32> to vector<8x128xi32>
    %93 = arith.cmpi eq, %92, %58 : vector<8x128xi32>
    %cst_16 = arith.constant 0.000000e+00 : f32
    %94 = vector.shape_cast %21 : vector<8x1xf32> to vector<8x1xf32>
    %95 = vector.broadcast %94 : vector<8x1xf32> to vector<8x128xf32>
    %96 = vector.broadcast %cst_16 : f32 to vector<8x128xf32>
    %97 = arith.select %93, %95, %96 : vector<8x128xi1>, vector<8x128xf32>
    %cst_17 = arith.constant dense<0.000000e+00> : vector<128xf32>
    %98 = vector.multi_reduction <add>, %97, %cst_17 [0] : vector<8x128xf32> to vector<128xf32>
    %99 = vector.shape_cast %98 : vector<128xf32> to vector<1x128xf32>
    %cst_18 = arith.constant 0.000000e+00 : f32
    %100 = vector.shape_cast %22 : vector<8x1xf32> to vector<8x1xf32>
    %101 = vector.broadcast %100 : vector<8x1xf32> to vector<8x128xf32>
    %102 = vector.broadcast %cst_18 : f32 to vector<8x128xf32>
    %103 = arith.select %93, %101, %102 : vector<8x128xi1>, vector<8x128xf32>
    %cst_19 = arith.constant dense<0.000000e+00> : vector<128xf32>
    %104 = vector.multi_reduction <add>, %103, %cst_19 [0] : vector<8x128xf32> to vector<128xf32>
    %105 = vector.shape_cast %104 : vector<128xf32> to vector<1x128xf32>
    %cst_20 = arith.constant 0.000000e+00 : f32
    %106 = vector.shape_cast %23 : vector<8x1xf32> to vector<8x1xf32>
    %107 = vector.broadcast %106 : vector<8x1xf32> to vector<8x128xf32>
    %108 = vector.broadcast %cst_20 : f32 to vector<8x128xf32>
    %109 = arith.select %93, %107, %108 : vector<8x128xi1>, vector<8x128xf32>
    %cst_21 = arith.constant dense<0.000000e+00> : vector<128xf32>
    %110 = vector.multi_reduction <add>, %109, %cst_21 [0] : vector<8x128xf32> to vector<128xf32>
    %111 = vector.shape_cast %110 : vector<128xf32> to vector<1x128xf32>
    %cst_22 = arith.constant 0.000000e+00 : f32
    %112 = vector.shape_cast %24 : vector<8x1xf32> to vector<8x1xf32>
    %113 = vector.broadcast %112 : vector<8x1xf32> to vector<8x128xf32>
    %114 = vector.broadcast %cst_22 : f32 to vector<8x128xf32>
    %115 = arith.select %93, %113, %114 : vector<8x128xi1>, vector<8x128xf32>
    %cst_23 = arith.constant dense<0.000000e+00> : vector<128xf32>
    %116 = vector.multi_reduction <add>, %115, %cst_23 [0] : vector<8x128xf32> to vector<128xf32>
    %117 = vector.shape_cast %116 : vector<128xf32> to vector<1x128xf32>
    %c0_i32_24 = arith.constant 0 : i32
    %118 = vector.shape_cast %26 : vector<8x1xi32> to vector<8x1xi32>
    %119 = vector.broadcast %118 : vector<8x1xi32> to vector<8x128xi32>
    %120 = vector.broadcast %c0_i32_24 : i32 to vector<8x128xi32>
    %121 = arith.select %93, %119, %120 : vector<8x128xi1>, vector<8x128xi32>
    %cst_25 = arith.constant dense<0> : vector<128xi32>
    %122 = vector.multi_reduction <add>, %121, %cst_25 [0] : vector<8x128xi32> to vector<128xi32>
    %123 = vector.shape_cast %122 : vector<128xi32> to vector<1x128xi32>
    %cst_26 = arith.constant 5.000000e-01 : f32
    %124 = vector.broadcast %cst_26 : f32 to vector<1x128xf32>
    %125 = arith.cmpf olt, %90, %124 : vector<1x128xf32>
    %c0_i32_27 = arith.constant 0 : i32
    %126 = vector.broadcast %c0_i32_27 : i32 to vector<1x128xi32>
    %127 = arith.select %125, %126, %123 : vector<1x128xi1>, vector<1x128xi32>
    %c0_28 = arith.constant 0 : index
    %c0_29 = arith.constant 0 : index
    %c0_30 = arith.constant 0 : index
    %128 = vector.load %arg5[%c0_28, %c0_29, %c0_30] : memref<1x1x128xi32, #tpu.memory_space<vmem>>, vector<1x1x128xi32>
    %129 = vector.shape_cast %128 : vector<1x1x128xi32> to vector<1x128xi32>
    %130 = vector.shape_cast %127 : vector<1x128xi32> to vector<1x1x128xi32>
    tpu.vector_store %arg5[%c0_28, %c0_29, %c0_30], %130 {strides = array<i32>} : memref<1x1x128xi32, #tpu.memory_space<vmem>>, vector<1x1x128xi32>,
    %131 = tpu.reciprocal %7 : vector<1x128xf32> -> vector<1x128xf32>
    %132 = tpu.reciprocal %8 : vector<1x128xf32> -> vector<1x128xf32>
    %133 = arith.subf %111, %99 : vector<1x128xf32>
    %cst_31 = arith.constant 9.99999996E-13 : f32
    %134 = vector.broadcast %cst_31 : f32 to vector<1x128xf32>
    %135 = arith.maximumf %133, %134 : vector<1x128xf32>
    %136 = arith.subf %117, %105 : vector<1x128xf32>
    %cst_32 = arith.constant 9.99999996E-13 : f32
    %137 = vector.broadcast %cst_32 : f32 to vector<1x128xf32>
    %138 = arith.maximumf %136, %137 : vector<1x128xf32>
    %139 = arith.addf %99, %111 : vector<1x128xf32>
    %cst_33 = arith.constant 5.000000e-01 : f32
    %140 = vector.broadcast %cst_33 : f32 to vector<1x128xf32>
    %141 = arith.mulf %139, %140 : vector<1x128xf32>
    %142 = arith.subf %141, %5 : vector<1x128xf32>
    %143 = arith.mulf %142, %131 : vector<1x128xf32>
    %cst_34 = arith.constant 1.000000e+01 : f32
    %144 = vector.broadcast %cst_34 : f32 to vector<1x128xf32>
    %145 = arith.mulf %143, %144 : vector<1x128xf32>
    %146 = arith.addf %105, %117 : vector<1x128xf32>
    %cst_35 = arith.constant 5.000000e-01 : f32
    %147 = vector.broadcast %cst_35 : f32 to vector<1x128xf32>
    %148 = arith.mulf %146, %147 : vector<1x128xf32>
    %149 = arith.subf %148, %6 : vector<1x128xf32>
    %150 = arith.mulf %149, %132 : vector<1x128xf32>
    %cst_36 = arith.constant 1.000000e+01 : f32
    %151 = vector.broadcast %cst_36 : f32 to vector<1x128xf32>
    %152 = arith.mulf %150, %151 : vector<1x128xf32>
    %153 = arith.mulf %135, %131 : vector<1x128xf32>
    %154 = math.log %153 : vector<1x128xf32>
    %cst_37 = arith.constant 5.000000e+00 : f32
    %155 = vector.broadcast %cst_37 : f32 to vector<1x128xf32>
    %156 = arith.mulf %154, %155 : vector<1x128xf32>
    %157 = arith.mulf %138, %132 : vector<1x128xf32>
    %158 = math.log %157 : vector<1x128xf32>
    %cst_38 = arith.constant 5.000000e+00 : f32
    %159 = vector.broadcast %cst_38 : f32 to vector<1x128xf32>
    %160 = arith.mulf %158, %159 : vector<1x128xf32>
    %161 = tpu.concatenate %145, %152, %156, %160 in 0 : vector<1x128xf32>, vector<1x128xf32>, vector<1x128xf32>, vector<1x128xf32> -> vector<4x128xf32>
    %c0_39 = arith.constant 0 : index
    %c0_40 = arith.constant 0 : index
    %c0_41 = arith.constant 0 : index
    %162 = vector.load %arg4[%c0_39, %c0_40, %c0_41] : memref<1x4x128xf32, #tpu.memory_space<vmem>>, vector<1x4x128xf32>
    %163 = vector.shape_cast %162 : vector<1x4x128xf32> to vector<4x128xf32>
    %164 = vector.shape_cast %161 : vector<4x128xf32> to vector<1x4x128xf32>
    tpu.vector_store %arg4[%c0_39, %c0_40, %c0_41], %164 {strides = array<i32>} : memref<1x4x128xf32, #tpu.memory_space<vmem>>, vector<1x4x128xf32>,
    %c0_i32_42 = arith.constant 0 : i32
    %165 = vector.broadcast %c0_i32_42 : i32 to vector<1x128xi32>
    %166 = arith.cmpi sgt, %127, %165 : vector<1x128xi32>
    %167 = arith.extui %166 : vector<1x128xi1> to vector<1x128xi32>
    %168 = arith.sitofp %167 : vector<1x128xi32> to vector<1x128xf32>
    %169 = vector.shape_cast %168 : vector<1x128xf32> to vector<1x1x128xf32>
    %cst_43 = arith.constant dense<0.000000e+00> : vector<1xf32>
    %170 = vector.multi_reduction <add>, %169, %cst_43 [1, 2] : vector<1x1x128xf32> to vector<1xf32>
    %171 = vector.shape_cast %170 : vector<1xf32> to vector<1x1x1xf32>
    %172 = vector.extract %171[0, 0, 0] : f32 from vector<1x1x1xf32>
    %173 = vector.broadcast %172 : f32 to vector<1x1xf32>
    %174 = vector.shape_cast %173 : vector<1x1xf32> to vector<1x1xf32>
    %175 = vector.broadcast %174 : vector<1x1xf32> to vector<1x128xf32>
    %c0_44 = arith.constant 0 : index
    %c0_45 = arith.constant 0 : index
    %c0_46 = arith.constant 0 : index
    %176 = vector.load %arg6[%c0_44, %c0_45, %c0_46] : memref<1x1x128xf32, #tpu.memory_space<vmem>>, vector<1x1x128xf32>
    %177 = vector.shape_cast %176 : vector<1x1x128xf32> to vector<1x128xf32>
    %178 = vector.shape_cast %175 : vector<1x128xf32> to vector<1x1x128xf32>
    tpu.vector_store %arg6[%c0_44, %c0_45, %c0_46], %178 {strides = array<i32>} : memref<1x1x128xf32, #tpu.memory_space<vmem>>, vector<1x1x128xf32>,
    return
  }
  func.func @transform_0(%arg0: i32, %arg1: memref<2xi32, #tpu.memory_space<smem>>) -> (i32, i32, i32) {
    %c0_i32 = arith.constant 0 : i32
    %c0_i32_0 = arith.constant 0 : i32
    %c0_i32_1 = arith.constant 0 : i32
    return %arg0, %c0_i32, %c0_i32_0 : i32, i32, i32
  }
  func.func @transform_1(%arg0: i32, %arg1: memref<2xi32, #tpu.memory_space<smem>>) -> (i32, i32) {
    %c0_i32 = arith.constant 0 : i32
    %c0_i32_0 = arith.constant 0 : i32
    %c0_i32_1 = arith.constant 0 : i32
    return %c0_i32, %c0_i32_0 : i32, i32
  }
  func.func @transform_2(%arg0: i32, %arg1: memref<2xi32, #tpu.memory_space<smem>>) -> (i32, i32, i32) {
    %c0_i32 = arith.constant 0 : i32
    %c0_i32_0 = arith.constant 0 : i32
    %c0_i32_1 = arith.constant 0 : i32
    return %arg0, %c0_i32, %c0_i32_0 : i32, i32, i32
  }
  func.func @transform_3(%arg0: i32, %arg1: memref<2xi32, #tpu.memory_space<smem>>) -> (i32, i32, i32) {
    %c0_i32 = arith.constant 0 : i32
    %c0_i32_0 = arith.constant 0 : i32
    %c0_i32_1 = arith.constant 0 : i32
    return %arg0, %c0_i32, %c0_i32_0 : i32, i32, i32
  }
  func.func @transform_4(%arg0: i32, %arg1: memref<2xi32, #tpu.memory_space<smem>>) -> (i32, i32, i32) {
    %c0_i32 = arith.constant 0 : i32
    %c0_i32_0 = arith.constant 0 : i32
    %c0_i32_1 = arith.constant 0 : i32
    return %arg0, %c0_i32, %c0_i32_0 : i32, i32, i32
  }
}

module attributes {stable_mosaic.version = 11 : i64} {
  func.func @_loss_kernel(%arg0: i32, %arg1: memref<1xi32, #tpu.memory_space<smem>>, %arg2: memref<1x128x4xf32, #tpu.memory_space<vmem>>, %arg3: memref<1x128x8xf32, #tpu.memory_space<vmem>>, %arg4: memref<1x4x128xf32, #tpu.memory_space<vmem>>, %arg5: memref<1x1x128xi32, #tpu.memory_space<vmem>>, %arg6: memref<1x1x128xf32, #tpu.memory_space<vmem>>, %arg7: memref<1x1x128xf32, #tpu.memory_space<vmem>>) attributes {dimension_semantics = [#tpu.dimension_semantics<parallel>], iteration_bounds = array<i64: 2>, scalar_prefetch = 1 : i64, scratch_operands = 0 : i64, tpu.core_type = #tpu.core_type<tc>, window_params = [{transform_indices = @transform_0, window_bounds = array<i64: 1, 128, 4>}, {transform_indices = @transform_1, window_bounds = array<i64: 1, 128, 8>}, {transform_indices = @transform_2, window_bounds = array<i64: 1, 4, 128>}, {transform_indices = @transform_3, window_bounds = array<i64: 1, 1, 128>}, {transform_indices = @transform_4, window_bounds = array<i64: 1, 1, 128>}, {transform_indices = @transform_5, window_bounds = array<i64: 1, 1, 128>}]} {
    %c0 = arith.constant 0 : index
    %0 = memref.load %arg1[%c0] : memref<1xi32, #tpu.memory_space<smem>>
    %1 = arith.sitofp %0 : i32 to f32
    %c0_0 = arith.constant 0 : index
    %c0_1 = arith.constant 0 : index
    %c0_2 = arith.constant 0 : index
    %2 = vector.load %arg5[%c0_0, %c0_1, %c0_2] : memref<1x1x128xi32, #tpu.memory_space<vmem>>, vector<1x1x128xi32>
    %3 = vector.shape_cast %2 : vector<1x1x128xi32> to vector<1x128xi32>
    %c0_i32 = arith.constant 0 : i32
    %4 = vector.broadcast %c0_i32 : i32 to vector<1x128xi32>
    %5 = arith.cmpi sgt, %3, %4 : vector<1x128xi32>
    %6 = arith.extui %5 : vector<1x128xi1> to vector<1x128xi32>
    %7 = arith.sitofp %6 : vector<1x128xi32> to vector<1x128xf32>
    %8 = vector.shape_cast %7 : vector<1x128xf32> to vector<1x1x128xf32>
    %cst = arith.constant dense<0.000000e+00> : vector<1xf32>
    %9 = vector.multi_reduction <add>, %8, %cst [1, 2] : vector<1x1x128xf32> to vector<1xf32>
    %10 = vector.shape_cast %9 : vector<1xf32> to vector<1x1x1xf32>
    %11 = vector.extract %10[0, 0, 0] : f32 from vector<1x1x1xf32>
    %12 = vector.broadcast %11 : f32 to vector<1x1xf32>
    %c0_3 = arith.constant 0 : index
    %c0_4 = arith.constant 0 : index
    %c0_5 = arith.constant 0 : index
    %13 = vector.load %arg2[%c0_3, %c0_4, %c0_5] : memref<1x128x4xf32, #tpu.memory_space<vmem>>, vector<1x128x4xf32>
    %14 = vector.shape_cast %13 : vector<1x128x4xf32> to vector<128x4xf32>
    %c0_6 = arith.constant 0 : index
    %c0_7 = arith.constant 0 : index
    %c0_8 = arith.constant 0 : index
    %15 = vector.load %arg3[%c0_6, %c0_7, %c0_8] : memref<1x128x8xf32, #tpu.memory_space<vmem>>, vector<1x128x8xf32>
    %16 = vector.shape_cast %15 : vector<1x128x8xf32> to vector<128x8xf32>
    %17 = tpu.iota {dimensions = array<i32: 0>} : vector<4x4xi32>
    %18 = tpu.iota {dimensions = array<i32: 1>} : vector<4x4xi32>
    %19 = arith.cmpi eq, %17, %18 : vector<4x4xi32>
    %20 = arith.extui %19 : vector<4x4xi1> to vector<4x4xi32>
    %21 = arith.sitofp %20 : vector<4x4xi32> to vector<4x4xf32>
    %cst_9 = arith.constant dense<0.000000e+00> : vector<4x128xf32>
    %22 = tpu.matmul %21, %14, %cst_9 {dimension_numbers = #tpu.dot_dimension_numbers<[1], [1], [0], [0], [0, 0, 1, 0], [], []>} : vector<4x4xf32>, vector<128x4xf32>, vector<4x128xf32> -> vector<4x128xf32>
    %23 = tpu.iota {dimensions = array<i32: 0>} : vector<8x8xi32>
    %24 = tpu.iota {dimensions = array<i32: 1>} : vector<8x8xi32>
    %25 = arith.cmpi eq, %23, %24 : vector<8x8xi32>
    %26 = arith.extui %25 : vector<8x8xi1> to vector<8x8xi32>
    %27 = arith.sitofp %26 : vector<8x8xi32> to vector<8x8xf32>
    %cst_10 = arith.constant dense<0.000000e+00> : vector<8x128xf32>
    %28 = tpu.matmul %27, %16, %cst_10 {dimension_numbers = #tpu.dot_dimension_numbers<[1], [1], [0], [0], [0, 0, 1, 0], [], []>} : vector<8x8xf32>, vector<128x8xf32>, vector<8x128xf32> -> vector<8x128xf32>
    %c0_11 = arith.constant 0 : index
    %c0_12 = arith.constant 0 : index
    %c0_13 = arith.constant 0 : index
    %29 = vector.load %arg4[%c0_11, %c0_12, %c0_13] : memref<1x4x128xf32, #tpu.memory_space<vmem>>, vector<1x4x128xf32>
    %30 = vector.shape_cast %29 : vector<1x4x128xf32> to vector<4x128xf32>
    %31 = arith.subf %22, %30 : vector<4x128xf32>
    %32 = math.absf %31 : vector<4x128xf32>
    %cst_14 = arith.constant 1.000000e+00 : f32
    %33 = vector.broadcast %cst_14 : f32 to vector<4x128xf32>
    %34 = arith.cmpf olt, %32, %33 : vector<4x128xf32>
    %cst_15 = arith.constant 5.000000e-01 : f32
    %35 = vector.broadcast %cst_15 : f32 to vector<4x128xf32>
    %36 = arith.mulf %35, %31 : vector<4x128xf32>
    %37 = arith.mulf %36, %31 : vector<4x128xf32>
    %cst_16 = arith.constant 5.000000e-01 : f32
    %38 = vector.broadcast %cst_16 : f32 to vector<4x128xf32>
    %39 = arith.subf %32, %38 : vector<4x128xf32>
    %40 = arith.select %34, %37, %39 : vector<4x128xi1>, vector<4x128xf32>
    %41 = vector.broadcast %7 : vector<1x128xf32> to vector<4x128xf32>
    %42 = arith.mulf %40, %41 : vector<4x128xf32>
    %43 = vector.shape_cast %42 : vector<4x128xf32> to vector<1x4x128xf32>
    %cst_17 = arith.constant dense<0.000000e+00> : vector<1xf32>
    %44 = vector.multi_reduction <add>, %43, %cst_17 [1, 2] : vector<1x4x128xf32> to vector<1xf32>
    %45 = vector.shape_cast %44 : vector<1xf32> to vector<1x1x1xf32>
    %46 = vector.extract %45[0, 0, 0] : f32 from vector<1x1x1xf32>
    %47 = vector.broadcast %46 : f32 to vector<1x1xf32>
    %cst_18 = arith.constant dense<0xFF800000> : vector<128xf32>
    %48 = vector.multi_reduction <maximumf>, %28, %cst_18 [0] : vector<8x128xf32> to vector<128xf32>
    %49 = vector.shape_cast %48 : vector<128xf32> to vector<1x128xf32>
    %50 = vector.broadcast %49 : vector<1x128xf32> to vector<8x128xf32>
    %51 = arith.subf %28, %50 : vector<8x128xf32>
    %52 = math.exp %51 : vector<8x128xf32>
    %cst_19 = arith.constant dense<0.000000e+00> : vector<128xf32>
    %53 = vector.multi_reduction <add>, %52, %cst_19 [0] : vector<8x128xf32> to vector<128xf32>
    %54 = vector.shape_cast %53 : vector<128xf32> to vector<1x128xf32>
    %55 = math.log %54 : vector<1x128xf32>
    %56 = arith.addf %55, %49 : vector<1x128xf32>
    %57 = tpu.iota {dimensions = array<i32: 0>} : vector<8x128xi32>
    %58 = vector.broadcast %3 : vector<1x128xi32> to vector<8x128xi32>
    %59 = arith.cmpi eq, %57, %58 : vector<8x128xi32>
    %cst_20 = arith.constant 0.000000e+00 : f32
    %60 = vector.broadcast %cst_20 : f32 to vector<8x128xf32>
    %61 = arith.select %59, %28, %60 : vector<8x128xi1>, vector<8x128xf32>
    %cst_21 = arith.constant dense<0.000000e+00> : vector<128xf32>
    %62 = vector.multi_reduction <add>, %61, %cst_21 [0] : vector<8x128xf32> to vector<128xf32>
    %63 = vector.shape_cast %62 : vector<128xf32> to vector<1x128xf32>
    %64 = arith.subf %56, %63 : vector<1x128xf32>
    %cst_22 = arith.constant 0.000000e+00 : f32
    %65 = vector.broadcast %cst_22 : f32 to vector<1x128xf32>
    %66 = arith.select %5, %65, %64 : vector<1x128xi1>, vector<1x128xf32>
    %cst_23 = arith.constant 3.000000e+00 : f32
    %67 = vector.broadcast %cst_23 : f32 to vector<1x1xf32>
    %68 = arith.mulf %67, %12 : vector<1x1xf32>
    %cst_24 = arith.constant 1.280000e+02 : f32
    %69 = arith.subf %cst_24, %1 : f32
    %cst_25 = arith.constant 1.000000e+00 : f32
    %70 = arith.subf %69, %cst_25 : f32
    %71 = vector.broadcast %70 : f32 to vector<1x1xf32>
    %72 = arith.minimumf %68, %71 : vector<1x1xf32>
    %cst_26 = arith.constant 0.000000e+00 : f32
    %73 = vector.broadcast %cst_26 : f32 to vector<1x1xf32>
    %74 = vector.shape_cast %66 : vector<1x128xf32> to vector<1x1x128xf32>
    %cst_27 = arith.constant dense<0xFF800000> : vector<1xf32>
    %75 = vector.multi_reduction <maximumf>, %74, %cst_27 [1, 2] : vector<1x1x128xf32> to vector<1xf32>
    %76 = vector.shape_cast %75 : vector<1xf32> to vector<1x1x1xf32>
    %77 = vector.extract %76[0, 0, 0] : f32 from vector<1x1x1xf32>
    %78 = vector.broadcast %77 : f32 to vector<1x1xf32>
    %c0_i32_28 = arith.constant 0 : i32
    %c30_i32 = arith.constant 30 : i32
    %79 = arith.addi %c0_i32_28, %c30_i32 : i32
    %c1_i32 = arith.constant 1 : i32
    %80:2 = scf.for %arg8 = %c0_i32_28 to %79 step %c1_i32 iter_args(%arg9 = %73, %arg10 = %78) -> (vector<1x1xf32>, vector<1x1xf32>)  : i32 {
      %102 = arith.addf %arg9, %arg10 : vector<1x1xf32>
      %cst_36 = arith.constant 5.000000e-01 : f32
      %103 = vector.broadcast %cst_36 : f32 to vector<1x1xf32>
      %104 = arith.mulf %103, %102 : vector<1x1xf32>
      %105 = vector.broadcast %104 : vector<1x1xf32> to vector<1x128xf32>
      %106 = arith.cmpf ogt, %66, %105 : vector<1x128xf32>
      %107 = arith.extui %106 : vector<1x128xi1> to vector<1x128xi32>
      %108 = arith.sitofp %107 : vector<1x128xi32> to vector<1x128xf32>
      %109 = vector.shape_cast %108 : vector<1x128xf32> to vector<1x1x128xf32>
      %cst_37 = arith.constant dense<0.000000e+00> : vector<1xf32>
      %110 = vector.multi_reduction <add>, %109, %cst_37 [1, 2] : vector<1x1x128xf32> to vector<1xf32>
      %111 = vector.shape_cast %110 : vector<1xf32> to vector<1x1x1xf32>
      %112 = vector.extract %111[0, 0, 0] : f32 from vector<1x1x1xf32>
      %113 = vector.broadcast %112 : f32 to vector<1x1xf32>
      %114 = arith.cmpf ogt, %113, %72 : vector<1x1xf32>
      %115 = arith.select %114, %104, %arg9 : vector<1x1xi1>, vector<1x1xf32>
      %116 = arith.select %114, %arg10, %104 : vector<1x1xi1>, vector<1x1xf32>
      scf.yield %115, %116 : vector<1x1xf32>, vector<1x1xf32>
    }
    %81 = vector.broadcast %80#1 : vector<1x1xf32> to vector<1x128xf32>
    %82 = arith.cmpf ogt, %66, %81 : vector<1x128xf32>
    %83 = arith.ori %5, %82 : vector<1x128xi1>
    %84 = arith.extui %83 : vector<1x128xi1> to vector<1x128xi32>
    %85 = arith.sitofp %84 : vector<1x128xi32> to vector<1x128xf32>
    %86 = arith.mulf %64, %85 : vector<1x128xf32>
    %87 = vector.shape_cast %86 : vector<1x128xf32> to vector<1x1x128xf32>
    %cst_29 = arith.constant dense<0.000000e+00> : vector<1xf32>
    %88 = vector.multi_reduction <add>, %87, %cst_29 [1, 2] : vector<1x1x128xf32> to vector<1xf32>
    %89 = vector.shape_cast %88 : vector<1xf32> to vector<1x1x1xf32>
    %90 = vector.extract %89[0, 0, 0] : f32 from vector<1x1x1xf32>
    %91 = vector.broadcast %90 : f32 to vector<1x1xf32>
    %92 = vector.shape_cast %47 : vector<1x1xf32> to vector<1x1xf32>
    %93 = vector.broadcast %92 : vector<1x1xf32> to vector<1x128xf32>
    %c0_30 = arith.constant 0 : index
    %c0_31 = arith.constant 0 : index
    %c0_32 = arith.constant 0 : index
    %94 = vector.load %arg6[%c0_30, %c0_31, %c0_32] : memref<1x1x128xf32, #tpu.memory_space<vmem>>, vector<1x1x128xf32>
    %95 = vector.shape_cast %94 : vector<1x1x128xf32> to vector<1x128xf32>
    %96 = vector.shape_cast %93 : vector<1x128xf32> to vector<1x1x128xf32>
    tpu.vector_store %arg6[%c0_30, %c0_31, %c0_32], %96 {strides = array<i32>} : memref<1x1x128xf32, #tpu.memory_space<vmem>>, vector<1x1x128xf32>,
    %97 = vector.shape_cast %91 : vector<1x1xf32> to vector<1x1xf32>
    %98 = vector.broadcast %97 : vector<1x1xf32> to vector<1x128xf32>
    %c0_33 = arith.constant 0 : index
    %c0_34 = arith.constant 0 : index
    %c0_35 = arith.constant 0 : index
    %99 = vector.load %arg7[%c0_33, %c0_34, %c0_35] : memref<1x1x128xf32, #tpu.memory_space<vmem>>, vector<1x1x128xf32>
    %100 = vector.shape_cast %99 : vector<1x1x128xf32> to vector<1x128xf32>
    %101 = vector.shape_cast %98 : vector<1x128xf32> to vector<1x1x128xf32>
    tpu.vector_store %arg7[%c0_33, %c0_34, %c0_35], %101 {strides = array<i32>} : memref<1x1x128xf32, #tpu.memory_space<vmem>>, vector<1x1x128xf32>,
    return
  }
  func.func @transform_0(%arg0: i32, %arg1: memref<1xi32, #tpu.memory_space<smem>>) -> (i32, i32, i32) {
    %c0_i32 = arith.constant 0 : i32
    %c0_i32_0 = arith.constant 0 : i32
    %c0_i32_1 = arith.constant 0 : i32
    return %arg0, %c0_i32, %c0_i32_0 : i32, i32, i32
  }
  func.func @transform_1(%arg0: i32, %arg1: memref<1xi32, #tpu.memory_space<smem>>) -> (i32, i32, i32) {
    %c0_i32 = arith.constant 0 : i32
    %c0_i32_0 = arith.constant 0 : i32
    %c0_i32_1 = arith.constant 0 : i32
    return %arg0, %c0_i32, %c0_i32_0 : i32, i32, i32
  }
  func.func @transform_2(%arg0: i32, %arg1: memref<1xi32, #tpu.memory_space<smem>>) -> (i32, i32, i32) {
    %c0_i32 = arith.constant 0 : i32
    %c0_i32_0 = arith.constant 0 : i32
    %c0_i32_1 = arith.constant 0 : i32
    return %arg0, %c0_i32, %c0_i32_0 : i32, i32, i32
  }
  func.func @transform_3(%arg0: i32, %arg1: memref<1xi32, #tpu.memory_space<smem>>) -> (i32, i32, i32) {
    %c0_i32 = arith.constant 0 : i32
    %c0_i32_0 = arith.constant 0 : i32
    %c0_i32_1 = arith.constant 0 : i32
    return %arg0, %c0_i32, %c0_i32_0 : i32, i32, i32
  }
  func.func @transform_4(%arg0: i32, %arg1: memref<1xi32, #tpu.memory_space<smem>>) -> (i32, i32, i32) {
    %c0_i32 = arith.constant 0 : i32
    %c0_i32_0 = arith.constant 0 : i32
    %c0_i32_1 = arith.constant 0 : i32
    return %arg0, %c0_i32, %c0_i32_0 : i32, i32, i32
  }
  func.func @transform_5(%arg0: i32, %arg1: memref<1xi32, #tpu.memory_space<smem>>) -> (i32, i32, i32) {
    %c0_i32 = arith.constant 0 : i32
    %c0_i32_0 = arith.constant 0 : i32
    %c0_i32_1 = arith.constant 0 : i32
    return %arg0, %c0_i32, %c0_i32_0 : i32, i32, i32
  }
}

</mosaic_0001>

<bundles_post_ra>
// kernel: multibox_loss_forward.2
= control target key start
LH: loop header
LB: loop body
LE: loop exit
PB: predicated region body
PF: predicated region fallthrough
CT: control target
= control target key end

     0   :  { %s749_s0 = inlined_call_operand.vmem [shape: s32[2], index: 0, kind: input, shape index: {}]   ;;  %s750_s1 = inlined_call_operand.vmem [shape: f32[2,8,5], index: 1, kind: input, shape index: {}]   ;;  %s751_s2 = inlined_call_operand.vmem [shape: f32[4,128], index: 2, kind: input, shape index: {}]   ;;  %s752_s3 = inlined_call_operand.vmem [shape: f32[2,4,128], index: 3, kind: output, shape index: {0}]   ;;  %s753_s4 = inlined_call_operand.vmem [shape: s32[2,1,128], index: 4, kind: output, shape index: {1}]   ;;  %s754_s5 = inlined_call_operand.vmem [shape: f32[2,1,128], index: 5, kind: output, shape index: {2}]  }
   0x1   :  { %s11_s20 = sshll.u32 %s749_s0, 4  ;;  %s12_s20 = int_to_ptr.vmem [resolvable:$true] %s11_s20 }
   0x2   :  { %s591_s21 = scalar_lea.vmem %s12_s20, 16  ;;  %p596_p1 = scmp.lt.s32.totalorder %s12_s20, %s12_s20 }
   0x3   :  { %p592_p0 = scmp.ne.s32.totalorder %s12_s20, %s591_s21  ;;  %p597_p2 = scmp.lt.s32.totalorder %s591_s21, %s591_s21 }
   0x5   :  { %p598_p3 = por %p597_p2, %p596_p1 }
   0x7   :  { %p599_p4 = pnand %p598_p3, %p592_p0 }
   0x9   :  { %602 = shalt.err (!%p599_p4)  }
   0xa   :  { %s613_s22 = smov [#allocation3]  }
   0xb   :  { %14 = dma.vmem_to_smem %s12_s20, 16, %s613_s22, [#allocation2] }
   0xc   :  { %607 = dma.done.wait [#allocation2], 16 }
   0xd   :  { %608 = vsyncadd [#allocation2], 4294967280 }
   0xe   :  { %16 = sfence }
   0xf   :  { %s655_s23 = smov 0  }
  0x10 LB: > { %s661_s0 = sadd.s32 4294967295, %s611_s23   ;;  %p550_p5 = scmp.ge.s32.totalorder %s611_s23, 1  ;;  %s611_s23 = sphi %s655_s23, %s22_s23  }
  0x11   : > { %p173_p6 = scmp.lt.s32.totalorder %s611_s23, 3 }
  0x13   : > { %p174_p7 = pnand %p550_p5, %p173_p6 }
  0x14   : > { %p203_p8 = scmp.lt.s32.totalorder (!%p174_p7), %s661_s0, 1  ;;  %v614_v0 = vmov (!%p174_p7), 2   ;;  %v615_v1 = vmov (!%p174_p7), 3   ;;  %s616_s29 = smov (!%p174_p7), 2   ;;  %v617_v3 = vmov (!%p174_p7), 0   ;;  %v618_v4 = vmov (!%p174_p7), 1  }
  0x15   : > { %177 = sbr.rel (%p174_p7) target bundleno = 1095 (0x447), region = 28  ;;  %577 = vset.pattern.permute.xlu1 (!%p174_p7), %v614_v0  ;;  %579 = vset.pattern.permute.xlu0 (!%p174_p7), %v615_v1  ;;  %s619_s30 = smov (!%p174_p7), 127   ;;  %v684_v9 = vld [vmem:[%s751_s2] sm:$0xf] (!%p174_p7)  ;;  %v227_v11 = vlaneseq (!%p174_p7)  ;;  %v620_v52 = vmov (!%p174_p7), 4   ;;  %vm421_vm15 = vcmask (!%p174_p7), 1040384  }
  0x16   : > { %v220_v10 = vmul.f32 (!%p174_p7), 0.5, %v684_v9  ;;  %s217_s8 = sld [smem:[#allocation3 + %s661_s0]] (!%p174_p7) }
  0x17   : > { %v689_v14 = vshrl.u32 (!%p174_p7), %v227_v11, 7  ;;  %v299_v47 = vand.u32 (!%p174_p7), 127, %v227_v11 }
  0x18   : > { %v222_v13 = vrot.slane (!%p174_p7), %v220_v10, 2 }
  0x19   : > { %v229_v17 = vsub.s32 (!%p174_p7), 0, %v689_v14  ;;  %v250_v19 = vsub.s32 (!%p174_p7), 1, %v689_v14 }
  0x1a   : > { %v225_v16 = vadd.f32 (!%p174_p7), %v222_v13, %v684_v9  ;;  %v224_v18 = vsub.f32 (!%p174_p7), %v684_v9, %v222_v13 }
  0x1c   : > { %s667_s24 = scalar_select %p203_p8, %s661_s0, 1  ;;  %v269_v20 = vsub.f32 %v225_v16, %v224_v18  ;;  %v230_v21 = vrot.slane %v225_v16, %v229_v17  ;;  %v240_v22 = vrot.slane %v224_v18, %v229_v17  ;;  %v260_v23 = vrot.slane %v224_v18, %v250_v19 }
  0x1d   : > { %v251_v24 = vrot.slane %v225_v16, %v250_v19  ;;  %v300_v42 = vstv %s217_s8 }
  0x1e   : > { %s551_s25 = sshll.u32 %s667_s24, 3  ;;  %v271_v27 = vrot.slane %v269_v20, 1  ;;  %vm707_vm0 = vcmp.lt.s32.totalorder %v689_v14, %v300_v42  ;;  %s213_s11 = scalar_lea.vmem %s753_s4, %s667_s24 }
  0x1f   : > { %s206_s28 = scalar_lea.vmem %s750_s1, %s551_s25  ;;  %s552_s12 = sshll.u32 %s667_s24, 2 }
  0x20   : > { %v673_v2 = vld [vmem:[%s206_s28] sm:$0xff]  ;;  %v273_v34 = vmul.f32 %v271_v27, %v269_v20  ;;  %s210_s15 = scalar_lea.vmem %s752_s3, %s552_s12  ;;  %s216_s18 = scalar_lea.vmem %s754_s5, %s667_s24 }
  0x21   : > { %274 = vrot.lane.b32.xlu0 %v673_v2, %s616_s29  ;;  %233 = vperm.xlu1 %577, %v673_v2   ;;  %v556_v57 = vtrunc.f32 %v673_v2 }
  0x22   : > { %v286_v37 = vrot.slane %v273_v34, %v229_v17 }
  0x23   : > { %v557_v58 = vcvt.f32.s32 %v556_v57 }
  0x25   : > { %578 = vset.pattern.permute.xlu1 %v617_v3 }
  0x26   : > { %242 = vperm.xlu1 %578, %v673_v2  }
  0x2a   : > { %580 = vset.pattern.permute.xlu1 %v618_v4 }
  0x2b   : > { %262 = vperm.xlu1 %580, %v673_v2  }
  0x2f   : > { %581 = vset.pattern.permute.xlu1 %v614_v0 }
  0x93   : > { %v275_v5 = vpop.permute.xlu0 %274 }
  0x94   : > { %v277_v6 = vsub.f32 %v673_v2, %v275_v5 }
  0x96   : > { %279 = vrot.lane.b32.xlu0 %v277_v6, %s619_s30 }
  0x9a   : > { %253 = vperm.xlu0 %579, %v673_v2  }
  0x9e   : > { %582 = vset.pattern.permute.xlu0 %v620_v52 }
  0xa0   : > { %v687_v12 = vpop.permute.xlu1 %233 }
  0xa1   : > { %v236_v28 = vmin.f32 %v230_v21, %v687_v12 }
  0xa5   : > { %v691_v15 = vpop.permute.xlu1 %242 }
  0xa6   : > { %v245_v29 = vmax.f32 %v240_v22, %v691_v15 }
  0xa8   : > { %v246_v32 = vsub.f32 %v236_v28, %v245_v29 }
  0xaa   : > { %v697_v25 = vpop.permute.xlu1 %262  ;;  %v247_v35 = vmax.f32 %v246_v32, 0.0 }
  0xab   : > { %v265_v30 = vmax.f32 %v260_v23, %v697_v25 }
 0x108   : > { %v280_v7 = vpop.permute.xlu0 %279 }
 0x109   : > { %v282_v8 = vmul.f32 %v280_v7, %v277_v6 }
 0x10b   : > { %289 = vperm.xlu1 %581, %v282_v8  }
 0x119   : > { %v699_v26 = vpop.permute.xlu0 %253 }
 0x11a   : > { %v256_v31 = vmin.f32 %v251_v24, %v699_v26 }
 0x11c   : > { %v266_v33 = vsub.f32 %v256_v31, %v265_v30 }
 0x11e   : > { %v267_v36 = vmax.f32 %v266_v33, 0.0 }
 0x120   : > { %v268_v39 = vmul.f32 %v267_v36, %v247_v35 }
 0x18a   : > { %v290_v38 = vpop.permute.xlu1 %289 }
 0x18b   : > { %v292_v40 = vadd.f32 %v290_v38, %v286_v37 }
 0x18d   : > { %v293_v41 = vsub.f32 %v292_v40, %v268_v39 }
 0x18f   : > { %583 = vrcp.f32 %v293_v41 }
 0x190   : > { %585 = vrcp.f32 %v684_v9 }
 0x199   : > { %v584_v43 = vpop.eup %583 }
 0x19a   : > { %v295_v45 = vmul.f32 %v584_v43, %v268_v39 }
 0x19c   : > { %v302_v46 = vsel %vm707_vm0, %v295_v45, -1.0 }
 0x19d   : > { %303 = vmax.xlane.f32.xlu0 %v302_v46  ;;  %v321_v59 = vrot.slane %v302_v46, 4 }
 0x19f   : > { %v322_v60 = vmax.f32 %v302_v46, %v321_v59 }
 0x1a1   : > { %v323_v61 = vrot.slane %v322_v60, 2 }
 0x1a3   : > { %v324_v62 = vmax.f32 %v322_v60, %v323_v61 }
 0x1a5   : > { %v325_v63 = vrot.slane %v324_v62, 1 }
 0x1a7   : > { %v714_v0 = vmax.f32 %v324_v62, %v325_v63  ;;  %v586_v62 = vpop.eup %585 }
 0x1a9   : > { %vm327_vm3 = vcmp.eq.f32.partialorder %v302_v46, %v714_v0 }
 0x1aa   : > { %v328_v1 = vsel %vm327_vm3, %v689_v14, 8 }
 0x1ab   : > { %v329_v3 = vrot.slane %v328_v1, 4 }
 0x1ad   : > { %vm330_vm4 = vcmp.lt.s32.totalorder %v328_v1, %v329_v3 }
 0x1ae   : > { %v331_v6 = vsel %vm330_vm4, %v328_v1, %v329_v3 }
 0x1af   : > { %v332_v10 = vrot.slane %v331_v6, 2 }
 0x1b1   : > { %vm333_vm7 = vcmp.lt.s32.totalorder %v331_v6, %v332_v10 }
 0x1b2   : > { %v334_v16 = vsel %vm333_vm7, %v331_v6, %v332_v10 }
 0x1b3   : > { %v335_v19 = vrot.slane %v334_v16, 1 }
 0x1b5   : > { %vm336_vm10 = vcmp.lt.s32.totalorder %v334_v16, %v335_v19 }
 0x1b6   : > { %v337_v23 = vsel %vm336_vm10, %v334_v16, %v335_v19 }
 0x22a   : > { %v304_v48 = vpop.xlane.xlu0 %303 }
 0x22b   : > { %vm305_vm1 = vcmp.eq.f32.partialorder %v302_v46, %v304_v48 }
 0x22c   : > { %v306_v49 = vsel %vm305_vm1, %v299_v47, 128  ;;  %vm423_vm1 = vcmask 1041408  }
 0x22d   : > { %v308_v50 = vshra.s32 %v306_v49, 16  ;;  %v307_v53 = vand.u32 65535, %v306_v49 }
 0x22f   : > { %v310_v51 = vcvt.s32.f32 %v308_v50  ;;  %v309_v55 = vcvt.s32.f32 %v307_v53 }
 0x231   : > { %311 = vmin.xlane.f32.xlu1 %v310_v51 }
 0x2be   : > { %v312_v54 = vpop.xlane.xlu1 %311 }
 0x2bf   : > { %vm313_vm2 = vcmp.eq.f32.partialorder %v310_v51, %v312_v54  ;;  %v318_v4 = vcvt.f32.s32 %v312_v54 }
 0x2c0   : > { %v314_v56 = vsel %vm313_vm2, %v309_v55, inf  ;;  %vm425_vm2 = vcmask 1042432  }
 0x2c1   : > { %315 = vmin.xlane.f32.xlu0 %v314_v56  ;;  %v319_v7 = vshll.u32 %v318_v4, 16 }
 0x2d7   : > { %383 = vperm.xlu0 %582, %v557_v58  }
 0x34e   : > { %v316_v5 = vpop.xlane.xlu0 %315 }
 0x34f   : > { %v317_v2 = vcvt.f32.s32 %v316_v5 }
 0x351   : > { %v320_v8 = vadd.s32 %v319_v7, %v317_v2 }
 0x353   : > { %vm338_vm5 = vcmp.eq.s32.totalorder %v320_v8, %v299_v47 }
 0x354   : > { %vm339_vm6 = vmand %vm338_vm5, %vm707_vm0 }
 0x355   : > { %v340_v11 = vsel %vm339_vm6, %v689_v14, 4294967295 }
 0x356   : > { %v341_v13 = vrot.slane %v340_v11, 4  ;;  %v384_v27 = vpop.permute.xlu0 %383 }
 0x358   : > { %vm342_vm8 = vcmp.gt.s32.totalorder %v340_v11, %v341_v13 }
 0x359   : > { %v343_v17 = vsel %vm342_vm8, %v340_v11, %v341_v13  ;;  %v404_v13 = vrot.slane %v586_v62, 2 }
 0x35a   : > { %v344_v18 = vrot.slane %v343_v17, 2 }
 0x35c   : > { %vm345_vm9 = vcmp.gt.s32.totalorder %v343_v17, %v344_v18 }
 0x35d   : > { %v346_v20 = vsel %vm345_vm9, %v343_v17, %v344_v18 }
 0x35e   : > { %v347_v21 = vrot.slane %v346_v20, 1 }
 0x360   : > { %vm348_vm11 = vcmp.gt.s32.totalorder %v346_v20, %v347_v21 }
 0x361   : > { %v349_v22 = vsel %vm348_vm11, %v346_v20, %v347_v21 }
 0x362   : > { %vm350_vm12 = vcmp.ge.s32.totalorder %v349_v22, 0 }
 0x363   : > { %v352_v24 = vsel %vm350_vm12, %v349_v22, %v337_v23  ;;  %v351_v57 = vsel %vm350_vm12, 2.0, %v714_v0  ;;  %v621_v0 = vmov 0.0  }
 0x364   : > { %vm353_vm13 = vcmp.eq.s32.totalorder %v352_v24, %v689_v14  ;;  %vm392_vm14 = vcmp.lt.f32.partialorder %v351_v57, 0.5 }
 0x365   : > { %v354_v28 = vsel %vm353_vm13, %v691_v15, 0.0  ;;  %v361_v29 = vsel %vm353_vm13, %v697_v25, 0.0  ;;  %v368_v30 = vsel %vm353_vm13, %v687_v12, 0.0  ;;  %v375_v31 = vsel %vm353_vm13, %v699_v26, 0.0 }
 0x366   : > { %v355_v32 = vrot.slane %v354_v28, 4  ;;  %v362_v33 = vrot.slane %v361_v29, 4  ;;  %v369_v34 = vrot.slane %v368_v30, 4  ;;  %v376_v35 = vrot.slane %v375_v31, 4 }
 0x367   : > { %v385_v36 = vsel %vm353_vm13, %v384_v27, 0 }
 0x368   : > { %v356_v37 = vadd.f32 %v355_v32, %v354_v28  ;;  %v363_v38 = vadd.f32 %v362_v33, %v361_v29  ;;  %v370_v39 = vadd.f32 %v369_v34, %v368_v30  ;;  %v377_v40 = vadd.f32 %v376_v35, %v375_v31 }
 0x369   : > { %v386_v14 = vrot.slane %v385_v36, 4 }
 0x36a   : > { %v357_v41 = vrot.slane %v356_v37, 2  ;;  %v364_v15 = vrot.slane %v363_v38, 2  ;;  %v371_v42 = vrot.slane %v370_v39, 2  ;;  %v378_v25 = vrot.slane %v377_v40, 2 }
 0x36b   : > { %v387_v43 = vadd.s32 %v386_v14, %v385_v36 }
 0x36c   : > { %v358_v12 = vadd.f32 %v357_v41, %v356_v37  ;;  %v365_v44 = vadd.f32 %v364_v15, %v363_v38  ;;  %v372_v26 = vadd.f32 %v371_v42, %v370_v39  ;;  %v379_v45 = vadd.f32 %v378_v25, %v377_v40 }
 0x36d   : > { %v388_v46 = vrot.slane %v387_v43, 2 }
 0x36e   : > { %v359_v47 = vrot.slane %v358_v12, 1  ;;  %v366_v48 = vrot.slane %v365_v44, 1  ;;  %v373_v49 = vrot.slane %v372_v26, 1  ;;  %v380_v50 = vrot.slane %v379_v45, 1 }
 0x36f   : > { %v389_v51 = vadd.s32 %v388_v46, %v387_v43 }
 0x370   : > { %v360_v52 = vadd.f32 %v359_v47, %v358_v12  ;;  %v367_v53 = vadd.f32 %v366_v48, %v365_v44  ;;  %v374_v54 = vadd.f32 %v373_v49, %v372_v26  ;;  %v381_v55 = vadd.f32 %v380_v50, %v379_v45 }
 0x371   : > { %v390_v56 = vrot.slane %v389_v51, 1 }
 0x372   : > { %v396_v58 = vsub.f32 %v374_v54, %v360_v52  ;;  %v398_v59 = vsub.f32 %v381_v55, %v367_v53  ;;  %v400_v60 = vadd.f32 %v374_v54, %v360_v52  ;;  %v408_v61 = vadd.f32 %v381_v55, %v367_v53 }
 0x373   : > { %v391_v63 = vadd.s32 %v390_v56, %v389_v51 }
 0x374   : > { %v397_v1 = vmax.f32 %v396_v58, 1e-12  ;;  %v399_v3 = vmax.f32 %v398_v59, 1e-12  ;;  %v401_v5 = vmul.f32 0.5, %v400_v60  ;;  %v409_v6 = vmul.f32 0.5, %v408_v61 }
 0x375   : > { %v393_v4 = vsel %vm392_vm14, 0, %v391_v63 }
 0x376   : > { %v413_v7 = vmul.f32 %v586_v62, %v397_v1  ;;  %v417_v2 = vmul.f32 %v586_v62, %v399_v3  ;;  %394 = vst [vmem:[%s213_s11] sm:$0x1] %v393_v4  ;;  %vm428_vm0 = vcmp.gt.s32.totalorder %v393_v4, 0  ;;  %v402_v11 = vsub.f32 %v401_v5, %v684_v9 }
 0x377   : > { %v553_v8 = vsel %vm428_vm0, 1.0, %v621_v0  ;;  %v410_v16 = vsub.f32 %v409_v6, %v684_v9 }
 0x378   : > { %587 = vlog2.f32 %v413_v7  ;;  %v431_v10 = vsel %vm421_vm15, %v553_v8, 0.0  ;;  %v406_v17 = vmul.f32 %v404_v13, %v402_v11 }
 0x379   : > { %589 = vlog2.f32 %v417_v2  ;;  %432 = vadd.xlane.f32.xlu1 %v431_v10  ;;  %v411_v18 = vmul.f32 %v410_v16, %v404_v13 }
 0x37a   : > { %v407_v20 = vmul.f32 10.0, %v406_v17 }
 0x37b   : > { %v412_v21 = vmul.f32 10.0, %v411_v18 }
 0x37d   : > { %v422_v9 = vsel %vm421_vm15, %v407_v20, %v412_v21 }
 0x382   : > { %v588_v19 = vpop.eup %587 }
 0x383   : > { %v590_v22 = vpop.eup %589  ;;  %v415_v23 = vmul.f32 0.6931472, %v588_v19 }
 0x384   : > { %v419_v24 = vmul.f32 0.6931472, %v590_v22 }
 0x385   : > { %v416_v27 = vmul.f32 5.0, %v415_v23 }
 0x386   : > { %v420_v28 = vmul.f32 5.0, %v419_v24 }
 0x387   : > { %v424_v29 = vsel %vm423_vm1, %v422_v9, %v416_v27 }
 0x388   : > { %v426_v30 = vsel %vm425_vm2, %v424_v29, %v420_v28 }
 0x389   : > { %427 = vst [vmem:[%s210_s15] sm:$0xf] %v426_v30 }
 0x406   : > { %v433_v31 = vpop.xlane.xlu1 %432 }
 0x407   : > { %v434_v32 = vrot.slane %v433_v31, 4 }
 0x409   : > { %v435_v33 = vadd.f32 %v434_v32, %v433_v31 }
 0x40b   : > { %v436_v34 = vrot.slane %v435_v33, 2 }
 0x40d   : > { %v437_v35 = vadd.f32 %v436_v34, %v435_v33 }
 0x40f   : > { %v438_v36 = vrot.slane %v437_v35, 1 }
 0x411   : > { %v439_v37 = vadd.f32 %v438_v36, %v437_v35 }
 0x413   : > { %558 = vpush %v439_v37 }
 0x444   : > { %s559_s19 = spop %558 }
 0x445   : > { %v441_v38 = vstv %s559_s19 }
 0x446   : > { %442 = vst [vmem:[%s216_s18] sm:$0x1] %v441_v38 }
 0x447 PF: > { %s22_s23 = sadd.s32 1, %s611_s23  }
 0x448   : > { %p19_p9 = scmp.ge.s32.totalorder %s22_s23, 4  }
 0x44a   :  { %21 = sbr.rel (!%p19_p9) target bundleno = 16 (0x10), region = 82 }

// kernel: multibox_loss_forward.3
= control target key start
LH: loop header
LB: loop body
LE: loop exit
PB: predicated region body
PF: predicated region fallthrough
CT: control target
= control target key end

     0   :  { %s1165_s23 = smov 0   ;;  %s1345_s0 = inlined_call_operand.<no memory space> [shape: s32[1], index: 0, kind: input, shape index: {}]   ;;  %s1346_s1 = inlined_call_operand.vmem [shape: f32[2,128,4], index: 1, kind: input, shape index: {}]   ;;  %s1347_s2 = inlined_call_operand.vmem [shape: f32[2,128,8], index: 2, kind: input, shape index: {}]   ;;  %s1348_s3 = inlined_call_operand.vmem [shape: f32[2,4,128], index: 3, kind: input, shape index: {}]   ;;  %s1349_s4 = inlined_call_operand.vmem [shape: s32[2,1,128], index: 4, kind: input, shape index: {}]   ;;  %s1350_s5 = inlined_call_operand.vmem [shape: f32[2,1,128], index: 5, kind: output, shape index: {0}]   ;;  %s1351_s6 = inlined_call_operand.vmem [shape: f32[2,1,128], index: 6, kind: output, shape index: {1}]  }
   0x1   :  { %12 = sst [smem:[#allocation3]] %s1345_s0 }
   0x2 LB: > { %s819_s24 = sadd.s32 4294967295, %s1109_s23   ;;  %p823_p0 = scmp.ge.s32.totalorder %s1109_s23, 1  ;;  %s1109_s23 = sphi %s1165_s23, %s18_s23  }
   0x3   : > { %p219_p1 = scmp.lt.s32.totalorder %s1109_s23, 3 }
   0x5   : > { %p220_p2 = pnand %p823_p0, %p219_p1 }
   0x6   : > { %p260_p3 = scmp.lt.s32.totalorder (!%p220_p2), %s819_s24, 1  ;;  %v1123_v0 = vmov (!%p220_p2), 0.0|0.0   ;;  %vm1124_vm0 = vmmov (!%p220_p2), 0   ;;  %v1125_v1 = vmov (!%p220_p2), 0.0   ;;  %vm462_vm1 = vcmask (!%p220_p2), 64512   ;;  %s283_s20 = sld [smem:[#allocation3]] (!%p220_p2) }
   0x7   : > { %223 = sbr.rel (%p220_p2) target bundleno = 985 (0x3d9), region = 36  ;;  %1009 = vmatprep.subr.bf16.mxu1 (!%p220_p2), %v1123_v0  ;;  %977 = vmatprep.subr.bf16.mxu0 (!%p220_p2), %v1123_v0  ;;  %vm1197_vm2 = vmpackc.low (!%p220_p2), %vm462_vm1, %vm462_vm1  ;;  %vm340_vm3 = vcmask (!%p220_p2), 31744   ;;  %v333_v48 = vlaneseq (!%p220_p2)  ;;  %vm289_vm7 = vcmask (!%p220_p2), 1040384   ;;  %vm598_vm10 = vcmask (!%p220_p2), 1043456   ;;  %s1318_s29 = smov (!%p220_p2), 0  }
   0x8   : > { %974 = vmatprep.mubr.msk.f32.mxu1 (!%p220_p2), %vm1124_vm0, %v1125_v1  ;;  %939 = vmatprep.mubr.msk.f32.mxu0 (!%p220_p2), %vm1124_vm0, %v1125_v1  ;;  %vm1212_vm4 = vmpackc.low (!%p220_p2), %vm340_vm3, %vm340_vm3 }
   0x9   : > { %v334_v52 = vshrl.u32 (!%p220_p2), %v333_v48, 7  ;;  %v336_v53 = vand.u32 (!%p220_p2), 127, %v333_v48 }
   0xb   : > { %vm337_vm5 = vcmp.eq.s32.totalorder (!%p220_p2), %v334_v52, %v336_v53  ;;  %v594_v59 = vsub.s32 (!%p220_p2), 0, %v334_v52 }
   0xc   : > { %v830_v55 = vsel (!%p220_p2), %vm337_vm5, 1.0, %v1125_v1  ;;  %s284_s21 = scvt.s32.f32 (!%p220_p2), %s283_s20 }
   0xe   : > { %s1357_s24 = smov (!%p260_p3, %s819_s24), 1  ;;  %s642_s22 = ssub.f32 128.0, %s284_s21 }
   0xf   : > { %s871_s0 = sshll.u32 %s1357_s24, 7  ;;  %s279_s27 = scalar_lea.vmem %s1350_s5, %s1357_s24 }
  0x10   : > { %s1187_s30 = scalar_lea.vmem %s1347_s2, %s871_s0  ;;  %s282_s9 = scalar_lea.vmem %s1351_s6, %s1357_s24 }
  0x11   : > { %v317_v2 = vld [vmem:[%s1187_s30] sm:$0xff]  ;;  %v318_v3 = vld [vmem:[%s1187_s30 + $0x8] sm:$0xff]  ;;  %s1204_s12 = scalar_lea.vmem %s1346_s1, %s871_s0  ;;  %v319_v9 = vld [vmem:[%s1187_s30 + $0x10] sm:$0xff]  ;;  %s276_s15 = scalar_lea.vmem %s1349_s4, %s1357_s24 }
  0x12   : > { %v1010_v5 = vpack.c.bf16 %v318_v3, %v317_v2  ;;  %v301_v6 = vld [vmem:[%s1204_s12] sm:$0xff]  ;;  %v302_v7 = vld [vmem:[%s1204_s12 + $0x8] sm:$0xff]  ;;  %v320_v10 = vld [vmem:[%s1187_s30 + $0x18] sm:$0xff]  ;;  %s828_s16 = sshll.u32 %s1357_s24, 2  ;;  %s866_s0 = sadd.f32 -1.0, %s642_s22 }
  0x13   : > { %v978_v11 = vpack.c.bf16 %v302_v7, %v301_v6  ;;  %v1014_v12 = vpack.c.bf16 %v320_v10, %v319_v9  ;;  %v303_v13 = vld [vmem:[%s1204_s12 + $0x10] sm:$0xff]  ;;  %v304_v14 = vld [vmem:[%s1204_s12 + $0x18] sm:$0xff]  ;;  %v321_v16 = vld [vmem:[%s1187_s30 + $0x20] sm:$0xff]  ;;  %s273_s19 = scalar_lea.vmem %s1348_s3, %s828_s16 }
  0x14   : > { %1012 = vmatpush3.bf16.xpose.msk.msra.mxu1 %vm1197_vm2, %v1010_v5  ;;  %v982_v15 = vpack.c.bf16 %v304_v14, %v303_v13  ;;  %v322_v17 = vld [vmem:[%s1187_s30 + $0x28] sm:$0xff]  ;;  %v305_v19 = vld [vmem:[%s1204_s12 + $0x20] sm:$0xff]  ;;  %v323_v22 = vld [vmem:[%s1187_s30 + $0x30] sm:$0xff]  ;;  %v644_v48 = vstv %s866_s0 }
  0x15   : > { %1013 = vmatprep.subr.bf16.mxu1 %v1123_v0  ;;  %980 = vmatpush3.bf16.xpose.msk.msra.mxu0 %vm1212_vm4, %v978_v11  ;;  %v1018_v18 = vpack.c.bf16 %v322_v17, %v321_v16  ;;  %v306_v20 = vld [vmem:[%s1204_s12 + $0x28] sm:$0xff]  ;;  %v324_v23 = vld [vmem:[%s1187_s30 + $0x38] sm:$0xff]  ;;  %v307_v25 = vld [vmem:[%s1204_s12 + $0x30] sm:$0xff] }
  0x16   : > { %981 = vmatprep.subr.bf16.mxu0 %v1123_v0  ;;  %v986_v21 = vpack.c.bf16 %v306_v20, %v305_v19  ;;  %v1022_v24 = vpack.c.bf16 %v324_v23, %v323_v22  ;;  %v308_v26 = vld [vmem:[%s1204_s12 + $0x38] sm:$0xff]  ;;  %v325_v28 = vld [vmem:[%s1187_s30 + $0x40] sm:$0xff]  ;;  %v326_v29 = vld [vmem:[%s1187_s30 + $0x48] sm:$0xff] }
  0x17   : > { %v990_v27 = vpack.c.bf16 %v308_v26, %v307_v25  ;;  %v1026_v30 = vpack.c.bf16 %v326_v29, %v325_v28  ;;  %v309_v31 = vld [vmem:[%s1204_s12 + $0x40] sm:$0xff]  ;;  %v310_v32 = vld [vmem:[%s1204_s12 + $0x48] sm:$0xff]  ;;  %v327_v34 = vld [vmem:[%s1187_s30 + $0x50] sm:$0xff] }
  0x18   : > { %v994_v33 = vpack.c.bf16 %v310_v32, %v309_v31  ;;  %v328_v35 = vld [vmem:[%s1187_s30 + $0x58] sm:$0xff]  ;;  %v311_v37 = vld [vmem:[%s1204_s12 + $0x50] sm:$0xff]  ;;  %v329_v40 = vld [vmem:[%s1187_s30 + $0x60] sm:$0xff] }
  0x19   : > { %v1030_v36 = vpack.c.bf16 %v328_v35, %v327_v34  ;;  %v312_v38 = vld [vmem:[%s1204_s12 + $0x58] sm:$0xff]  ;;  %v330_v41 = vld [vmem:[%s1187_s30 + $0x68] sm:$0xff]  ;;  %v313_v43 = vld [vmem:[%s1204_s12 + $0x60] sm:$0xff] }
  0x1a   : > { %v998_v39 = vpack.c.bf16 %v312_v38, %v311_v37  ;;  %v1034_v42 = vpack.c.bf16 %v330_v41, %v329_v40  ;;  %v314_v44 = vld [vmem:[%s1204_s12 + $0x68] sm:$0xff]  ;;  %v331_v46 = vld [vmem:[%s1187_s30 + $0x70] sm:$0xff]  ;;  %v332_v47 = vld [vmem:[%s1187_s30 + $0x78] sm:$0xff] }
  0x1b   : > { %v1002_v45 = vpack.c.bf16 %v314_v44, %v313_v43  ;;  %v1038_v49 = vpack.c.bf16 %v332_v47, %v331_v46  ;;  %v315_v50 = vld [vmem:[%s1204_s12 + $0x70] sm:$0xff]  ;;  %v316_v51 = vld [vmem:[%s1204_s12 + $0x78] sm:$0xff]  ;;  %v1295_v56 = vld [vmem:[%s276_s15] sm:$0x1] }
  0x1c   : > { %1016 = vmatpush3.bf16.xpose.msk.msra.mxu1 %vm1197_vm2, %v1014_v12  ;;  %v1006_v54 = vpack.c.bf16 %v316_v51, %v315_v50  ;;  %vm286_vm6 = vcmp.gt.s32.totalorder %v1295_v56, 0  ;;  %v630_v60 = vrot.slane %v1295_v56, %v594_v59 }
  0x1d   : > { %1017 = vmatprep.subr.bf16.mxu1 %v1123_v0  ;;  %984 = vmatpush3.bf16.xpose.msk.msra.mxu0 %vm1212_vm4, %v982_v15  ;;  %v829_v57 = vsel %vm286_vm6, 1.0, %v1125_v1 }
  0x1e   : > { %985 = vmatprep.subr.bf16.mxu0 %v1123_v0  ;;  %v290_v58 = vsel %vm289_vm7, %v829_v57, 0.0  ;;  %vm631_vm8 = vcmp.eq.s32.totalorder %v334_v52, %v630_v60  ;;  %v595_v11 = vrot.slane %v829_v57, %v594_v59 }
  0x1f   : > { %291 = vadd.xlane.f32.xlu0 %v290_v58 }
  0x24   : > { %1020 = vmatpush3.bf16.xpose.msk.msra.mxu1 %vm1197_vm2, %v1018_v18 }
  0x25   : > { %1021 = vmatprep.subr.bf16.mxu1 %v1123_v0  ;;  %988 = vmatpush3.bf16.xpose.msk.msra.mxu0 %vm1212_vm4, %v986_v21 }
  0x26   : > { %989 = vmatprep.subr.bf16.mxu0 %v1123_v0 }
  0x2c   : > { %1024 = vmatpush3.bf16.xpose.msk.msra.mxu1 %vm1197_vm2, %v1022_v24 }
  0x2d   : > { %1025 = vmatprep.subr.bf16.mxu1 %v1123_v0  ;;  %992 = vmatpush3.bf16.xpose.msk.msra.mxu0 %vm1212_vm4, %v990_v27 }
  0x2e   : > { %993 = vmatprep.subr.bf16.mxu0 %v1123_v0 }
  0x34   : > { %1028 = vmatpush3.bf16.xpose.msk.msra.mxu1 %vm1197_vm2, %v1026_v30 }
  0x35   : > { %1029 = vmatprep.subr.bf16.mxu1 %v1123_v0  ;;  %996 = vmatpush3.bf16.xpose.msk.msra.mxu0 %vm1212_vm4, %v994_v33 }
  0x36   : > { %997 = vmatprep.subr.bf16.mxu0 %v1123_v0 }
  0x3c   : > { %1032 = vmatpush3.bf16.xpose.msk.msra.mxu1 %vm1197_vm2, %v1030_v36 }
  0x3d   : > { %1033 = vmatprep.subr.bf16.mxu1 %v1123_v0  ;;  %1000 = vmatpush3.bf16.xpose.msk.msra.mxu0 %vm1212_vm4, %v998_v39 }
  0x3e   : > { %1001 = vmatprep.subr.bf16.mxu0 %v1123_v0 }
  0x44   : > { %1036 = vmatpush3.bf16.xpose.msk.msra.mxu1 %vm1197_vm2, %v1034_v42 }
  0x45   : > { %1037 = vmatprep.subr.bf16.mxu1 %v1123_v0  ;;  %1004 = vmatpush3.bf16.xpose.msk.msra.mxu0 %vm1212_vm4, %v1002_v45 }
  0x46   : > { %1005 = vmatprep.subr.bf16.mxu0 %v1123_v0  ;;  %v583_v0 = vld [vmem:[%s273_s19] sm:$0xf] }
  0x4c   : > { %1040 = vmatpush3.bf16.xpose.msk.msra.mxu1 %vm1197_vm2, %v1038_v49 }
  0x4d   : > { %1008 = vmatpush3.bf16.xpose.msk.msra.mxu0 %vm1212_vm4, %v1006_v54 }
  0x53   : > { %975 = vmatmul.mubr.msk.f32.vlgmr.msra.gmra.mrb[0].mxu1 %vm462_vm1, %v830_v55 }
  0x54   : > { %940 = vmatmul.mubr.msk.f32.vlgmr.msra.gmra.mrb[0].mxu0 %vm340_vm3, %v830_v55 }
  0xac   : > { %v292_v38 = vpop.xlane.xlu0 %291 }
  0xad   : > { %v293_v40 = vrot.slane %v292_v38, 4 }
  0xaf   : > { %v294_v42 = vadd.f32 %v293_v40, %v292_v38 }
  0xb1   : > { %v295_v43 = vrot.slane %v294_v42, 2 }
  0xb3   : > { %v296_v44 = vadd.f32 %v295_v43, %v294_v42 }
  0xb5   : > { %v297_v45 = vrot.slane %v296_v44, 1 }
  0xb7   : > { %v298_v46 = vadd.f32 %v297_v45, %v296_v44 }
  0xb9   : > { %1041 = vpush %v298_v46 }
  0xea   : > { %s1042_s25 = spop %1041 }
  0xeb   : > { %v300_v47 = vstv %s1042_s25 }
  0xec   : > { %v641_v49 = vmul.f32 3.0, %v300_v47 }
  0xee   : > { %v645_v50 = vmin.f32 %v641_v49, %v644_v48 }
 0x126   : > { %v579_v61 = vpop.f32.mrb[0].mxu1 }
 0x127   : > { %v609_v62 = vrot.slane %v579_v61, 4  ;;  %v976_v63 = vpop.f32.mrb[1].mxu1  ;;  %v632_v2 = vsel %vm631_vm8, %v579_v61, 0.0  ;;  %v458_v4 = vpop.f32.mrb[0].mxu0 }
 0x128   : > { %v584_v5 = vsub.f32 %v458_v4, %v583_v0  ;;  %v941_v6 = vpop.f32.mrb[1].mxu0  ;;  %v633_v25 = vrot.slane %v632_v2, 4 }
 0x129   : > { %v610_v3 = vmax.f32 %v579_v61, %v609_v62 }
 0x12a   : > { %v585_v8 = vand.u32 2147483647, %v584_v5  ;;  %v587_v9 = vmul.f32 0.5, %v584_v5  ;;  %v634_v28 = vadd.f32 %v633_v25, %v632_v2 }
 0x12b   : > { %v611_v7 = vrot.slane %v610_v3, 2 }
 0x12c   : > { %v588_v12 = vmul.f32 %v587_v9, %v584_v5  ;;  %v865_v13 = vadd.f32 -0.5, %v585_v8  ;;  %vm586_vm9 = vcmp.lt.f32.partialorder %v585_v8, 1.0  ;;  %v635_v30 = vrot.slane %v634_v28, 2 }
 0x12d   : > { %v612_v10 = vmax.f32 %v610_v3, %v611_v7  ;;  %v1115_v5 = vmov 0.0  }
 0x12e   : > { %v590_v15 = vsel %vm586_vm9, %v588_v12, %v865_v13  ;;  %v636_v31 = vadd.f32 %v635_v30, %v634_v28 }
 0x12f   : > { %v613_v14 = vrot.slane %v612_v10, 1  ;;  %v597_v17 = vmul.f32 %v595_v11, %v590_v15 }
 0x130   : > { %v637_v32 = vrot.slane %v636_v31, 1 }
 0x131   : > { %v614_v16 = vmax.f32 %v612_v10, %v613_v14  ;;  %v599_v19 = vsel %vm598_vm10, %v597_v17, 0.0 }
 0x132   : > { %600 = vadd.xlane.f32.xlu0 %v599_v19  ;;  %v638_v36 = vadd.f32 %v637_v32, %v636_v31 }
 0x133   : > { %v615_v18 = vsub.f32 %v579_v61, %v614_v16 }
 0x135   : > { %v616_v20 = vmul.f32 1.442695, %v615_v18 }
 0x137   : > { %1087 = vpow2.f32 %v616_v20 }
 0x141   : > { %v1088_v21 = vpop.eup %1087 }
 0x142   : > { %v618_v22 = vrot.slane %v1088_v21, 4 }
 0x144   : > { %v619_v23 = vadd.f32 %v1088_v21, %v618_v22 }
 0x146   : > { %v620_v24 = vrot.slane %v619_v23, 2 }
 0x148   : > { %v621_v26 = vadd.f32 %v620_v24, %v619_v23 }
 0x14a   : > { %v622_v27 = vrot.slane %v621_v26, 1 }
 0x14c   : > { %v623_v29 = vadd.f32 %v622_v27, %v621_v26 }
 0x14e   : > { %1089 = vlog2.f32 %v623_v29 }
 0x158   : > { %v1090_v33 = vpop.eup %1089 }
 0x159   : > { %v625_v34 = vmul.f32 0.6931472, %v1090_v33 }
 0x15b   : > { %v626_v35 = vadd.f32 %v625_v34, %v614_v16 }
 0x15d   : > { %v1307_v37 = vsub.f32 %v626_v35, %v638_v36 }
 0x15f   : > { %v1312_v39 = vsel %vm286_vm6, 0.0, %v1307_v37 }
 0x160   : > { %v646_v41 = vsel %vm289_vm7, %v1312_v39, -inf }
 0x161   : > { %647 = vmax.xlane.f32.xlu1 %v646_v41 }
 0x1bf   : > { %v601_v51 = vpop.xlane.xlu0 %600 }
 0x1c0   : > { %v602_v52 = vrot.slane %v601_v51, 4 }
 0x1c2   : > { %v603_v53 = vadd.f32 %v602_v52, %v601_v51 }
 0x1c4   : > { %v604_v54 = vrot.slane %v603_v53, 2 }
 0x1c6   : > { %v605_v55 = vadd.f32 %v604_v54, %v603_v53 }
 0x1c8   : > { %v606_v57 = vrot.slane %v605_v55, 1 }
 0x1ca   : > { %v607_v58 = vadd.f32 %v606_v57, %v605_v55 }
 0x1cc   : > { %1043 = vpush %v607_v58 }
 0x1ee   : > { %v648_v59 = vpop.xlane.xlu1 %647 }
 0x1ef   : > { %v649_v60 = vrot.slane %v648_v59, 4 }
 0x1f1   : > { %v650_v61 = vmax.f32 %v648_v59, %v649_v60 }
 0x1f3   : > { %v651_v62 = vrot.slane %v650_v61, 2 }
 0x1f5   : > { %v652_v63 = vmax.f32 %v650_v61, %v651_v62 }
 0x1f7   : > { %v653_v0 = vrot.slane %v652_v63, 1 }
 0x1f9   : > { %v654_v2 = vmax.f32 %v652_v63, %v653_v0 }
 0x1fb   : > { %1045 = vpush %v654_v2 }
 0x1fd   : > { %s1316_s26 = spop %1043 }
 0x22c   : > { %s1046_s28 = spop %1045 }
 0x22d   : > { %v656_v3 = vstv %s1046_s28  }
 0x22e   : > { %v1111_v4 = vmov %v656_v3  }
 0x22f LB: >> { %v665_v6 = vadd.f32 %v1113_v4, %v1117_v5  ;;  %v1126_v8 = vmov 0.0   ;;  %s662_s29 = sadd.s32 1, %s1121_s29   ;;  %s1121_s29 = sphi %s1318_s29, %s662_s29   ;;  %v1117_v5 = vphi %v1115_v5, %v682_v5   ;;  %v1113_v4 = vphi %v1111_v4, %v1112_v4  }
 0x230   : >> { %p659_p4 = scmp.ge.s32.totalorder %s662_s29, 30  }
 0x231   : >> { %v666_v7 = vmul.f32 0.5, %v665_v6  ;;  %v699_v23 = vstv (%p659_p4), %s1316_s26 }
 0x232   : > { %700 = vst [vmem:[%s279_s27] sm:$0x1] (%p659_p4), %v699_v23 }
 0x233   : >> { %vm667_vm11 = vcmp.gt.f32.partialorder %v1312_v39, %v666_v7 }
 0x234   : >> { %v867_v9 = vsel %vm667_vm11, 1.0, %v1126_v8 }
 0x235   : >> { %v670_v10 = vsel %vm289_vm7, %v867_v9, 0.0 }
 0x236   : >> { %671 = vadd.xlane.f32.xlu0 %v670_v10 }
 0x2c3   : >> { %v672_v11 = vpop.xlane.xlu0 %671 }
 0x2c4   : >> { %v673_v12 = vrot.slane %v672_v11, 4 }
 0x2c6   : >> { %v674_v13 = vadd.f32 %v673_v12, %v672_v11 }
 0x2c8   : >> { %v675_v14 = vrot.slane %v674_v13, 2 }
 0x2ca   : >> { %v676_v15 = vadd.f32 %v675_v14, %v674_v13 }
 0x2cc   : >> { %v677_v16 = vrot.slane %v676_v15, 1 }
 0x2ce   : >> { %v678_v17 = vadd.f32 %v677_v16, %v676_v15 }
 0x2d0   : >> { %1047 = vpush %v678_v17 }
 0x2ff   : > { %661 = sbr.rel (!%p659_p4) target bundleno = 559 (0x22f), region = 94 }
 0x301   : >> { %s1048_s30 = spop %1047 }
 0x302   : >> { %v680_v18 = vstv %s1048_s30 }
 0x303   : >> { %vm681_vm12 = vcmp.gt.f32.partialorder %v680_v18, %v645_v50 }
 0x304   : >> { %v682_v5 = vsel %vm681_vm12, %v666_v7, %v1117_v5   ;;  %v683_v19 = vsel %vm681_vm12, %v1113_v4, %v666_v7  }
 0x305   : >> { %v1112_v4 = vmov %v683_v19   ;;  %vm684_vm13 = vcmp.gt.f32.partialorder (%p659_p4), %v1312_v39, %v683_v19 }
 0x306   : > { %vm685_vm14 = vmor %vm286_vm6, %vm684_vm13 }
 0x307   : > { %v868_v20 = vsel %vm685_vm14, 1.0, %v1125_v1 }
 0x308   : > { %v688_v21 = vmul.f32 %v868_v20, %v1307_v37 }
 0x30a   : > { %v689_v22 = vsel %vm289_vm7, %v688_v21, 0.0 }
 0x30b   : > { %690 = vadd.xlane.f32.xlu0 %v689_v22 }
 0x398   : > { %v691_v24 = vpop.xlane.xlu0 %690 }
 0x399   : > { %v692_v25 = vrot.slane %v691_v24, 4 }
 0x39b   : > { %v693_v26 = vadd.f32 %v692_v25, %v691_v24 }
 0x39d   : > { %v694_v27 = vrot.slane %v693_v26, 2 }
 0x39f   : > { %v695_v56 = vadd.f32 %v694_v27, %v693_v26 }
 0x3a1   : > { %v696_v28 = vrot.slane %v695_v56, 1 }
 0x3a3   : > { %v697_v29 = vadd.f32 %v696_v28, %v695_v56 }
 0x3a5   : > { %1049 = vpush %v697_v29 }
 0x3d6   : > { %s1050_s10 = spop %1049 }
 0x3d7   : > { %v701_v1 = vstv %s1050_s10 }
 0x3d8   : > { %702 = vst [vmem:[%s282_s9] sm:$0x1] %v701_v1 }
 0x3d9 PF: > { %s18_s23 = sadd.s32 1, %s1109_s23  }
 0x3da   : > { %p15_p5 = scmp.ge.s32.totalorder %s18_s23, 4  }
 0x3dc   :  { %17 = sbr.rel (!%p15_p5) target bundleno = 2 (0x2), region = 105 }

</bundles_post_ra>
